<compile_context>
chip_gen: v7x
topology: tpu7x:2x2x1
jax: 0.10.0
libtpu: 0.0.40
codegen_flags: <defaults>
</compile_context>

<pallas_src>
import jax
import jax.numpy as jnp
from jax.experimental import pallas as pl
from jax.experimental.pallas import tpu as pltpu

# ----------------------------- config -------------------------------------
DRUG_NUM = 16                       # (was 1373)
MIC_NUM  = 8                        # (was 173)
DM_NUM   = DRUG_NUM + MIC_NUM       # rows of the hetero (drug+microbe) tables
HOP_DIM  = 128                      # per-hop feature width  (was 768)
IN_DIM   = 2 * HOP_DIM              # 256  (was 1536)
HID_DIM  = 128                      # (was 512)
OUT_DIM  = 128                      # (was 128)
PAIR_DIM = 2 * OUT_DIM              # homo || hete = 256 lanes (lane-dense)


# --------------------------- fused kernel ----------------------------------
def _ffn(a, b, w1_ref, b1_ref, w2_ref, b2_ref):
    """Two-layer tanh MLP on one gathered row.

    L1 is applied as a split matmul (a @ W1[0] + b @ W1[1]) so the
    cat([1hop, 2hop], dim=1) of the reference never materializes.
    tanh goes to the EUP slot; matmuls accumulate in f32 on the MXU.
    """
    h = (jnp.dot(a, w1_ref[0], preferred_element_type=jnp.float32)
         + jnp.dot(b, w1_ref[1], preferred_element_type=jnp.float32)
         + b1_ref[...])
    h = jnp.tanh(h)
    y = jnp.dot(h, w2_ref[...], preferred_element_type=jnp.float32) + b2_ref[...]
    return jnp.tanh(y)


def _fused_kernel(x1_ref, x2_ref,                                   # SMEM (prefetch)
                  drg1_ref, drg2_ref, mic1_ref, mic2_ref,           # gathered rows
                  dm1d_ref, dm2d_ref, dm1m_ref, dm2m_ref,           # gathered rows
                  w1d_ref, b1d_ref, w2d_ref, b2d_ref,               # FFN_homo_drug
                  w1m_ref, b1m_ref, w2m_ref, b2m_ref,               # FFN_homo_mic
                  w1h_ref, b1h_ref, w2h_ref, b2h_ref,               # FFN_hete
                  out_ref):
    # Each gathered row ref is (1, 1, HOP); drop the gather dim -> (1, HOP).
    y_drg = _ffn(drg1_ref[0], drg2_ref[0], w1d_ref, b1d_ref, w2d_ref, b2d_ref)
    y_mic = _ffn(mic1_ref[0], mic2_ref[0], w1m_ref, b1m_ref, w2m_ref, b2m_ref)
    y_dm1 = _ffn(dm1d_ref[0], dm2d_ref[0], w1h_ref, b1h_ref, w2h_ref, b2h_ref)
    y_dm2 = _ffn(dm1m_ref[0], dm2m_ref[0], w1h_ref, b1h_ref, w2h_ref, b2h_ref)

    # out[b,0,0,:] = [drg_embed[x1] | dm_embed[x1]]
    # out[b,0,1,:] = [mic_embed[x2] | dm_embed[x2 + DRUG_NUM]]
    top = jnp.concatenate([y_drg, y_dm1], axis=1)      # (1, 2*OUT), 128-aligned seam
    bot = jnp.concatenate([y_mic, y_dm2], axis=1)
    out_ref[...] = jnp.concatenate([top, bot], axis=0).reshape(1, 1, 2, PAIR_DIM)


# ------------------------------ wrapper -------------------------------------
def neighbor_info_forward(params, drg1hop, drg2hop, mic1hop, mic2hop,
                          dm1hop, dm2hop, x1, x2):
    B = x1.shape[0]

    # (N, HOP) -> (N, 1, HOP): the gathered block (1, 1, HOP) then has its last
    # two dims equal to the full array dims (legal layout), and the leading
    # (unconstrained) axis carries the data-dependent row index.
    def as3d(t):
        return t.reshape(t.shape[0], 1, t.shape[1])

    def row_spec(col_fn):
        return pl.BlockSpec((1, 1, HOP_DIM),
                            lambda b, x1r, x2r: (col_fn(b, x1r, x2r), 0, 0))

    drug_row = row_spec(lambda b, x1r, x2r: x1r[b])
    mic_row  = row_spec(lambda b, x1r, x2r: x2r[b])
    dm_d_row = row_spec(lambda b, x1r, x2r: x1r[b])
    dm_m_row = row_spec(lambda b, x1r, x2r: x2r[b] + DRUG_NUM)

    def full_spec(shape):
        n = len(shape)
        return pl.BlockSpec(shape, lambda b, x1r, x2r, _n=n: (0,) * _n)

    def ffn_specs(p):
        return [full_spec(p["w1"].shape), full_spec(p["b1"].shape),
                full_spec(p["w2"].shape), full_spec(p["b2"].shape)]

    in_specs = ([drug_row, drug_row, mic_row, mic_row,
                 dm_d_row, dm_d_row, dm_m_row, dm_m_row]
                + ffn_specs(params["d"])
                + ffn_specs(params["m"])
                + ffn_specs(params["dm"]))

    grid_spec = pltpu.PrefetchScalarGridSpec(
        num_scalar_prefetch=2,                 # x1, x2 -> SMEM, feed index_maps
        grid=(B,),                             # one (drug, microbe) pair per step
        in_specs=in_specs,
        out_specs=pl.BlockSpec((1, 1, 2, PAIR_DIM),
                               lambda b, x1r, x2r: (b, 0, 0, 0)),
    )

    pd, pm, ph = params["d"], params["m"], params["dm"]
    dm1_3d, dm2_3d = as3d(dm1hop), as3d(dm2hop)

    return pl.pallas_call(
        _fused_kernel,
        grid_spec=grid_spec,
        out_shape=jax.ShapeDtypeStruct((B, 1, 2, PAIR_DIM), jnp.float32),
        compiler_params=pltpu.CompilerParams(
            dimension_semantics=("parallel",)),   # pairs are independent (v7x 2-TC)
    )(x1.astype(jnp.int32), x2.astype(jnp.int32),
      as3d(drg1hop), as3d(drg2hop), as3d(mic1hop), as3d(mic2hop),
      dm1_3d, dm2_3d, dm1_3d, dm2_3d,
      pd["w1"], pd["b1"], pd["w2"], pd["b2"],
      pm["w1"], pm["b1"], pm["w2"], pm["b2"],
      ph["w1"], ph["b1"], ph["w2"], ph["b2"])


# ------------------------- parameter init ----------------------------------
def init_params(key):
    def ffn_params(k):
        k1, k2, k3, k4 = jax.random.split(k, 4)
        lim1 = 1.0 / float(IN_DIM) ** 0.5
        lim2 = 1.0 / float(HID_DIM) ** 0.5
        return {
            # nn.Linear(IN, HID): weight stored transposed (IN, HID) and split
            # into the two hop halves -> (2, HOP, HID) for the split matmul.
            "w1": jax.random.uniform(k1, (2, HOP_DIM, HID_DIM), jnp.float32, -lim1, lim1),
            "b1": jax.random.uniform(k2, (1, HID_DIM), jnp.float32, -lim1, lim1),
            "w2": jax.random.uniform(k3, (HID_DIM, OUT_DIM), jnp.float32, -lim2, lim2),
            "b2": jax.random.uniform(k4, (1, OUT_DIM), jnp.float32, -lim2, lim2),
        }
    kd, km, kh = jax.random.split(key, 3)
    return {"d": ffn_params(kd), "m": ffn_params(km), "dm": ffn_params(kh)}


# ---------------------- pure-JAX reference (for check) ----------------------
def _ffn_ref(x, p):
    w1 = p["w1"].reshape(IN_DIM, HID_DIM)
    h = jnp.tanh(x @ w1 + p["b1"])
    return jnp.tanh(h @ p["w2"] + p["b2"])


def reference_forward(params, drg1hop, drg2hop, mic1hop, mic2hop,
                      dm1hop, dm2hop, x1, x2):
    drg = _ffn_ref(jnp.concatenate([drg1hop, drg2hop], axis=1), params["d"])
    mic = _ffn_ref(jnp.concatenate([mic1hop, mic2hop], axis=1), params["m"])
    dm  = _ffn_ref(jnp.concatenate([dm1hop, dm2hop], axis=1), params["dm"])
    hete = jnp.concatenate([dm[x1][:, None, None, :],
                            dm[x2 + DRUG_NUM][:, None, None, :]], axis=2)
    homo = jnp.concatenate([drg[x1][:, None, None, :],
                            mic[x2][:, None, None, :]], axis=2)
    return jnp.concatenate([homo, hete], axis=3)


# ------------------------------ main ----------------------------------------
if __name__ == "__main__":
    key = jax.random.PRNGKey(0)
    kp, k1, k2, k3, k4, k5, k6, kx1, kx2 = jax.random.split(key, 9)

    params = init_params(kp)
    B = 4
    drg1hop = jax.random.normal(k1, (DRUG_NUM, HOP_DIM), jnp.float32)
    drg2hop = jax.random.normal(k2, (DRUG_NUM, HOP_DIM), jnp.float32)
    mic1hop = jax.random.normal(k3, (MIC_NUM, HOP_DIM), jnp.float32)
    mic2hop = jax.random.normal(k4, (MIC_NUM, HOP_DIM), jnp.float32)
    dm1hop  = jax.random.normal(k5, (DM_NUM, HOP_DIM), jnp.float32)
    dm2hop  = jax.random.normal(k6, (DM_NUM, HOP_DIM), jnp.float32)
    x1 = jax.random.randint(kx1, (B,), 0, DRUG_NUM)
    x2 = jax.random.randint(kx2, (B,), 0, MIC_NUM)

    fwd = jax.jit(neighbor_info_forward)
    out = jax.block_until_ready(
        fwd(params, drg1hop, drg2hop, mic1hop, mic2hop, dm1hop, dm2hop, x1, x2))

    assert out.shape == (B, 1, 2, PAIR_DIM), out.shape
    assert out.dtype == jnp.float32

    ref = reference_forward(params, drg1hop, drg2hop, mic1hop, mic2hop,
                            dm1hop, dm2hop, x1, x2)
    max_err = float(jnp.max(jnp.abs(out - ref)))
    # Loose tolerance: MXU multi-pass f32 vs XLA default dot precision.
    assert max_err < 1e-2, f"max abs err {max_err}"

    print("KERNEL_OK")
</pallas_src>

<mosaic_0001>
module attributes {stable_mosaic.version = 11 : i64} {
  func.func @_fused_kernel(%arg0: i32, %arg1: memref<4xi32, #tpu.memory_space<smem>>, %arg2: memref<4xi32, #tpu.memory_space<smem>>, %arg3: memref<1x1x128xf32, #tpu.memory_space<vmem>>, %arg4: memref<1x1x128xf32, #tpu.memory_space<vmem>>, %arg5: memref<1x1x128xf32, #tpu.memory_space<vmem>>, %arg6: memref<1x1x128xf32, #tpu.memory_space<vmem>>, %arg7: memref<1x1x128xf32, #tpu.memory_space<vmem>>, %arg8: memref<1x1x128xf32, #tpu.memory_space<vmem>>, %arg9: memref<1x1x128xf32, #tpu.memory_space<vmem>>, %arg10: memref<1x1x128xf32, #tpu.memory_space<vmem>>, %arg11: memref<2x128x128xf32, #tpu.memory_space<vmem>>, %arg12: memref<1x128xf32, #tpu.memory_space<vmem>>, %arg13: memref<128x128xf32, #tpu.memory_space<vmem>>, %arg14: memref<1x128xf32, #tpu.memory_space<vmem>>, %arg15: memref<2x128x128xf32, #tpu.memory_space<vmem>>, %arg16: memref<1x128xf32, #tpu.memory_space<vmem>>, %arg17: memref<128x128xf32, #tpu.memory_space<vmem>>, %arg18: memref<1x128xf32, #tpu.memory_space<vmem>>, %arg19: memref<2x128x128xf32, #tpu.memory_space<vmem>>, %arg20: memref<1x128xf32, #tpu.memory_space<vmem>>, %arg21: memref<128x128xf32, #tpu.memory_space<vmem>>, %arg22: memref<1x128xf32, #tpu.memory_space<vmem>>, %arg23: memref<1x1x2x256xf32, #tpu.memory_space<vmem>>) attributes {dimension_semantics = [#tpu.dimension_semantics<parallel>], iteration_bounds = array<i64: 4>, scalar_prefetch = 2 : i64, scratch_operands = 0 : i64, tpu.core_type = #tpu.core_type<tc>, window_params = [{transform_indices = @transform_0, window_bounds = array<i64: 1, 1, 128>}, {transform_indices = @transform_1, window_bounds = array<i64: 1, 1, 128>}, {transform_indices = @transform_2, window_bounds = array<i64: 1, 1, 128>}, {transform_indices = @transform_3, window_bounds = array<i64: 1, 1, 128>}, {transform_indices = @transform_4, window_bounds = array<i64: 1, 1, 128>}, {transform_indices = @transform_5, window_bounds = array<i64: 1, 1, 128>}, {transform_indices = @transform_6, window_bounds = array<i64: 1, 1, 128>}, {transform_indices = @transform_7, window_bounds = array<i64: 1, 1, 128>}, {pipeline_mode = #tpu.pipeline_mode<synchronous>, transform_indices = @transform_8, window_bounds = array<i64: 2, 128, 128>}, {pipeline_mode = #tpu.pipeline_mode<synchronous>, transform_indices = @transform_9, window_bounds = array<i64: 1, 128>}, {pipeline_mode = #tpu.pipeline_mode<synchronous>, transform_indices = @transform_10, window_bounds = array<i64: 128, 128>}, {pipeline_mode = #tpu.pipeline_mode<synchronous>, transform_indices = @transform_11, window_bounds = array<i64: 1, 128>}, {pipeline_mode = #tpu.pipeline_mode<synchronous>, transform_indices = @transform_12, window_bounds = array<i64: 2, 128, 128>}, {pipeline_mode = #tpu.pipeline_mode<synchronous>, transform_indices = @transform_13, window_bounds = array<i64: 1, 128>}, {pipeline_mode = #tpu.pipeline_mode<synchronous>, transform_indices = @transform_14, window_bounds = array<i64: 128, 128>}, {pipeline_mode = #tpu.pipeline_mode<synchronous>, transform_indices = @transform_15, window_bounds = array<i64: 1, 128>}, {pipeline_mode = #tpu.pipeline_mode<synchronous>, transform_indices = @transform_16, window_bounds = array<i64: 2, 128, 128>}, {pipeline_mode = #tpu.pipeline_mode<synchronous>, transform_indices = @transform_17, window_bounds = array<i64: 1, 128>}, {pipeline_mode = #tpu.pipeline_mode<synchronous>, transform_indices = @transform_18, window_bounds = array<i64: 128, 128>}, {pipeline_mode = #tpu.pipeline_mode<synchronous>, transform_indices = @transform_19, window_bounds = array<i64: 1, 128>}, {transform_indices = @transform_20, window_bounds = array<i64: 1, 1, 2, 256>}]} {
    %c0 = arith.constant 0 : index
    %c0_0 = arith.constant 0 : index
    %c0_1 = arith.constant 0 : index
    %0 = vector.load %arg3[%c0, %c0_0, %c0_1] : memref<1x1x128xf32, #tpu.memory_space<vmem>>, vector<1x1x128xf32>
    %1 = vector.shape_cast %0 : vector<1x1x128xf32> to vector<1x128xf32>
    %c0_2 = arith.constant 0 : index
    %c0_3 = arith.constant 0 : index
    %c0_4 = arith.constant 0 : index
    %2 = vector.load %arg4[%c0_2, %c0_3, %c0_4] : memref<1x1x128xf32, #tpu.memory_space<vmem>>, vector<1x1x128xf32>
    %3 = vector.shape_cast %2 : vector<1x1x128xf32> to vector<1x128xf32>
    %c0_5 = arith.constant 0 : index
    %c0_6 = arith.constant 0 : index
    %c0_7 = arith.constant 0 : index
    %4 = vector.load %arg11[%c0_5, %c0_6, %c0_7] : memref<2x128x128xf32, #tpu.memory_space<vmem>>, vector<1x128x128xf32>
    %5 = vector.shape_cast %4 : vector<1x128x128xf32> to vector<128x128xf32>
    %cst = arith.constant dense<0.000000e+00> : vector<1x128xf32>
    %6 = tpu.matmul %1, %5, %cst {dimension_numbers = #tpu.dot_dimension_numbers<[1], [0], [0], [1], [0, 0, 1, 1], [], []>} : vector<1x128xf32>, vector<128x128xf32>, vector<1x128xf32> -> vector<1x128xf32>
    %c1 = arith.constant 1 : index
    %c0_8 = arith.constant 0 : index
    %c0_9 = arith.constant 0 : index
    %7 = vector.load %arg11[%c1, %c0_8, %c0_9] : memref<2x128x128xf32, #tpu.memory_space<vmem>>, vector<1x128x128xf32>
    %8 = vector.shape_cast %7 : vector<1x128x128xf32> to vector<128x128xf32>
    %cst_10 = arith.constant dense<0.000000e+00> : vector<1x128xf32>
    %9 = tpu.matmul %3, %8, %cst_10 {dimension_numbers = #tpu.dot_dimension_numbers<[1], [0], [0], [1], [0, 0, 1, 1], [], []>} : vector<1x128xf32>, vector<128x128xf32>, vector<1x128xf32> -> vector<1x128xf32>
    %10 = arith.addf %6, %9 : vector<1x128xf32>
    %c0_11 = arith.constant 0 : index
    %c0_12 = arith.constant 0 : index
    %11 = vector.load %arg12[%c0_11, %c0_12] : memref<1x128xf32, #tpu.memory_space<vmem>>, vector<1x128xf32>
    %12 = arith.addf %10, %11 : vector<1x128xf32>
    %13 = math.tanh %12 : vector<1x128xf32>
    %c0_13 = arith.constant 0 : index
    %c0_14 = arith.constant 0 : index
    %14 = vector.load %arg13[%c0_13, %c0_14] : memref<128x128xf32, #tpu.memory_space<vmem>>, vector<128x128xf32>
    %cst_15 = arith.constant dense<0.000000e+00> : vector<1x128xf32>
    %15 = tpu.matmul %13, %14, %cst_15 {dimension_numbers = #tpu.dot_dimension_numbers<[1], [0], [0], [1], [0, 0, 1, 1], [], []>} : vector<1x128xf32>, vector<128x128xf32>, vector<1x128xf32> -> vector<1x128xf32>
    %c0_16 = arith.constant 0 : index
    %c0_17 = arith.constant 0 : index
    %16 = vector.load %arg14[%c0_16, %c0_17] : memref<1x128xf32, #tpu.memory_space<vmem>>, vector<1x128xf32>
    %17 = arith.addf %15, %16 : vector<1x128xf32>
    %18 = math.tanh %17 : vector<1x128xf32>
    %c0_18 = arith.constant 0 : index
    %c0_19 = arith.constant 0 : index
    %c0_20 = arith.constant 0 : index
    %19 = vector.load %arg5[%c0_18, %c0_19, %c0_20] : memref<1x1x128xf32, #tpu.memory_space<vmem>>, vector<1x1x128xf32>
    %20 = vector.shape_cast %19 : vector<1x1x128xf32> to vector<1x128xf32>
    %c0_21 = arith.constant 0 : index
    %c0_22 = arith.constant 0 : index
    %c0_23 = arith.constant 0 : index
    %21 = vector.load %arg6[%c0_21, %c0_22, %c0_23] : memref<1x1x128xf32, #tpu.memory_space<vmem>>, vector<1x1x128xf32>
    %22 = vector.shape_cast %21 : vector<1x1x128xf32> to vector<1x128xf32>
    %c0_24 = arith.constant 0 : index
    %c0_25 = arith.constant 0 : index
    %c0_26 = arith.constant 0 : index
    %23 = vector.load %arg15[%c0_24, %c0_25, %c0_26] : memref<2x128x128xf32, #tpu.memory_space<vmem>>, vector<1x128x128xf32>
    %24 = vector.shape_cast %23 : vector<1x128x128xf32> to vector<128x128xf32>
    %cst_27 = arith.constant dense<0.000000e+00> : vector<1x128xf32>
    %25 = tpu.matmul %20, %24, %cst_27 {dimension_numbers = #tpu.dot_dimension_numbers<[1], [0], [0], [1], [0, 0, 1, 1], [], []>} : vector<1x128xf32>, vector<128x128xf32>, vector<1x128xf32> -> vector<1x128xf32>
    %c1_28 = arith.constant 1 : index
    %c0_29 = arith.constant 0 : index
    %c0_30 = arith.constant 0 : index
    %26 = vector.load %arg15[%c1_28, %c0_29, %c0_30] : memref<2x128x128xf32, #tpu.memory_space<vmem>>, vector<1x128x128xf32>
    %27 = vector.shape_cast %26 : vector<1x128x128xf32> to vector<128x128xf32>
    %cst_31 = arith.constant dense<0.000000e+00> : vector<1x128xf32>
    %28 = tpu.matmul %22, %27, %cst_31 {dimension_numbers = #tpu.dot_dimension_numbers<[1], [0], [0], [1], [0, 0, 1, 1], [], []>} : vector<1x128xf32>, vector<128x128xf32>, vector<1x128xf32> -> vector<1x128xf32>
    %29 = arith.addf %25, %28 : vector<1x128xf32>
    %c0_32 = arith.constant 0 : index
    %c0_33 = arith.constant 0 : index
    %30 = vector.load %arg16[%c0_32, %c0_33] : memref<1x128xf32, #tpu.memory_space<vmem>>, vector<1x128xf32>
    %31 = arith.addf %29, %30 : vector<1x128xf32>
    %32 = math.tanh %31 : vector<1x128xf32>
    %c0_34 = arith.constant 0 : index
    %c0_35 = arith.constant 0 : index
    %33 = vector.load %arg17[%c0_34, %c0_35] : memref<128x128xf32, #tpu.memory_space<vmem>>, vector<128x128xf32>
    %cst_36 = arith.constant dense<0.000000e+00> : vector<1x128xf32>
    %34 = tpu.matmul %32, %33, %cst_36 {dimension_numbers = #tpu.dot_dimension_numbers<[1], [0], [0], [1], [0, 0, 1, 1], [], []>} : vector<1x128xf32>, vector<128x128xf32>, vector<1x128xf32> -> vector<1x128xf32>
    %c0_37 = arith.constant 0 : index
    %c0_38 = arith.constant 0 : index
    %35 = vector.load %arg18[%c0_37, %c0_38] : memref<1x128xf32, #tpu.memory_space<vmem>>, vector<1x128xf32>
    %36 = arith.addf %34, %35 : vector<1x128xf32>
    %37 = math.tanh %36 : vector<1x128xf32>
    %c0_39 = arith.constant 0 : index
    %c0_40 = arith.constant 0 : index
    %c0_41 = arith.constant 0 : index
    %38 = vector.load %arg7[%c0_39, %c0_40, %c0_41] : memref<1x1x128xf32, #tpu.memory_space<vmem>>, vector<1x1x128xf32>
    %39 = vector.shape_cast %38 : vector<1x1x128xf32> to vector<1x128xf32>
    %c0_42 = arith.constant 0 : index
    %c0_43 = arith.constant 0 : index
    %c0_44 = arith.constant 0 : index
    %40 = vector.load %arg8[%c0_42, %c0_43, %c0_44] : memref<1x1x128xf32, #tpu.memory_space<vmem>>, vector<1x1x128xf32>
    %41 = vector.shape_cast %40 : vector<1x1x128xf32> to vector<1x128xf32>
    %c0_45 = arith.constant 0 : index
    %c0_46 = arith.constant 0 : index
    %c0_47 = arith.constant 0 : index
    %42 = vector.load %arg19[%c0_45, %c0_46, %c0_47] : memref<2x128x128xf32, #tpu.memory_space<vmem>>, vector<1x128x128xf32>
    %43 = vector.shape_cast %42 : vector<1x128x128xf32> to vector<128x128xf32>
    %cst_48 = arith.constant dense<0.000000e+00> : vector<1x128xf32>
    %44 = tpu.matmul %39, %43, %cst_48 {dimension_numbers = #tpu.dot_dimension_numbers<[1], [0], [0], [1], [0, 0, 1, 1], [], []>} : vector<1x128xf32>, vector<128x128xf32>, vector<1x128xf32> -> vector<1x128xf32>
    %c1_49 = arith.constant 1 : index
    %c0_50 = arith.constant 0 : index
    %c0_51 = arith.constant 0 : index
    %45 = vector.load %arg19[%c1_49, %c0_50, %c0_51] : memref<2x128x128xf32, #tpu.memory_space<vmem>>, vector<1x128x128xf32>
    %46 = vector.shape_cast %45 : vector<1x128x128xf32> to vector<128x128xf32>
    %cst_52 = arith.constant dense<0.000000e+00> : vector<1x128xf32>
    %47 = tpu.matmul %41, %46, %cst_52 {dimension_numbers = #tpu.dot_dimension_numbers<[1], [0], [0], [1], [0, 0, 1, 1], [], []>} : vector<1x128xf32>, vector<128x128xf32>, vector<1x128xf32> -> vector<1x128xf32>
    %48 = arith.addf %44, %47 : vector<1x128xf32>
    %c0_53 = arith.constant 0 : index
    %c0_54 = arith.constant 0 : index
    %49 = vector.load %arg20[%c0_53, %c0_54] : memref<1x128xf32, #tpu.memory_space<vmem>>, vector<1x128xf32>
    %50 = arith.addf %48, %49 : vector<1x128xf32>
    %51 = math.tanh %50 : vector<1x128xf32>
    %c0_55 = arith.constant 0 : index
    %c0_56 = arith.constant 0 : index
    %52 = vector.load %arg21[%c0_55, %c0_56] : memref<128x128xf32, #tpu.memory_space<vmem>>, vector<128x128xf32>
    %cst_57 = arith.constant dense<0.000000e+00> : vector<1x128xf32>
    %53 = tpu.matmul %51, %52, %cst_57 {dimension_numbers = #tpu.dot_dimension_numbers<[1], [0], [0], [1], [0, 0, 1, 1], [], []>} : vector<1x128xf32>, vector<128x128xf32>, vector<1x128xf32> -> vector<1x128xf32>
    %c0_58 = arith.constant 0 : index
    %c0_59 = arith.constant 0 : index
    %54 = vector.load %arg22[%c0_58, %c0_59] : memref<1x128xf32, #tpu.memory_space<vmem>>, vector<1x128xf32>
    %55 = arith.addf %53, %54 : vector<1x128xf32>
    %56 = math.tanh %55 : vector<1x128xf32>
    %c0_60 = arith.constant 0 : index
    %c0_61 = arith.constant 0 : index
    %c0_62 = arith.constant 0 : index
    %57 = vector.load %arg9[%c0_60, %c0_61, %c0_62] : memref<1x1x128xf32, #tpu.memory_space<vmem>>, vector<1x1x128xf32>
    %58 = vector.shape_cast %57 : vector<1x1x128xf32> to vector<1x128xf32>
    %c0_63 = arith.constant 0 : index
    %c0_64 = arith.constant 0 : index
    %c0_65 = arith.constant 0 : index
    %59 = vector.load %arg10[%c0_63, %c0_64, %c0_65] : memref<1x1x128xf32, #tpu.memory_space<vmem>>, vector<1x1x128xf32>
    %60 = vector.shape_cast %59 : vector<1x1x128xf32> to vector<1x128xf32>
    %c0_66 = arith.constant 0 : index
    %c0_67 = arith.constant 0 : index
    %c0_68 = arith.constant 0 : index
    %61 = vector.load %arg19[%c0_66, %c0_67, %c0_68] : memref<2x128x128xf32, #tpu.memory_space<vmem>>, vector<1x128x128xf32>
    %62 = vector.shape_cast %61 : vector<1x128x128xf32> to vector<128x128xf32>
    %cst_69 = arith.constant dense<0.000000e+00> : vector<1x128xf32>
    %63 = tpu.matmul %58, %62, %cst_69 {dimension_numbers = #tpu.dot_dimension_numbers<[1], [0], [0], [1], [0, 0, 1, 1], [], []>} : vector<1x128xf32>, vector<128x128xf32>, vector<1x128xf32> -> vector<1x128xf32>
    %c1_70 = arith.constant 1 : index
    %c0_71 = arith.constant 0 : index
    %c0_72 = arith.constant 0 : index
    %64 = vector.load %arg19[%c1_70, %c0_71, %c0_72] : memref<2x128x128xf32, #tpu.memory_space<vmem>>, vector<1x128x128xf32>
    %65 = vector.shape_cast %64 : vector<1x128x128xf32> to vector<128x128xf32>
    %cst_73 = arith.constant dense<0.000000e+00> : vector<1x128xf32>
    %66 = tpu.matmul %60, %65, %cst_73 {dimension_numbers = #tpu.dot_dimension_numbers<[1], [0], [0], [1], [0, 0, 1, 1], [], []>} : vector<1x128xf32>, vector<128x128xf32>, vector<1x128xf32> -> vector<1x128xf32>
    %67 = arith.addf %63, %66 : vector<1x128xf32>
    %c0_74 = arith.constant 0 : index
    %c0_75 = arith.constant 0 : index
    %68 = vector.load %arg20[%c0_74, %c0_75] : memref<1x128xf32, #tpu.memory_space<vmem>>, vector<1x128xf32>
    %69 = arith.addf %67, %68 : vector<1x128xf32>
    %70 = math.tanh %69 : vector<1x128xf32>
    %c0_76 = arith.constant 0 : index
    %c0_77 = arith.constant 0 : index
    %71 = vector.load %arg21[%c0_76, %c0_77] : memref<128x128xf32, #tpu.memory_space<vmem>>, vector<128x128xf32>
    %cst_78 = arith.constant dense<0.000000e+00> : vector<1x128xf32>
    %72 = tpu.matmul %70, %71, %cst_78 {dimension_numbers = #tpu.dot_dimension_numbers<[1], [0], [0], [1], [0, 0, 1, 1], [], []>} : vector<1x128xf32>, vector<128x128xf32>, vector<1x128xf32> -> vector<1x128xf32>
    %c0_79 = arith.constant 0 : index
    %c0_80 = arith.constant 0 : index
    %73 = vector.load %arg22[%c0_79, %c0_80] : memref<1x128xf32, #tpu.memory_space<vmem>>, vector<1x128xf32>
    %74 = arith.addf %72, %73 : vector<1x128xf32>
    %75 = math.tanh %74 : vector<1x128xf32>
    %76 = tpu.concatenate %18, %56 in 1 : vector<1x128xf32>, vector<1x128xf32> -> vector<1x256xf32>
    %77 = tpu.concatenate %37, %75 in 1 : vector<1x128xf32>, vector<1x128xf32> -> vector<1x256xf32>
    %78 = tpu.concatenate %76, %77 in 0 : vector<1x256xf32>, vector<1x256xf32> -> vector<2x256xf32>
    %79 = vector.shape_cast %78 : vector<2x256xf32> to vector<1x1x2x256xf32>
    %c0_81 = arith.constant 0 : index
    %c0_82 = arith.constant 0 : index
    %c0_83 = arith.constant 0 : index
    %c0_84 = arith.constant 0 : index
    %80 = vector.load %arg23[%c0_81, %c0_82, %c0_83, %c0_84] : memref<1x1x2x256xf32, #tpu.memory_space<vmem>>, vector<1x1x2x256xf32>
    tpu.vector_store %arg23[%c0_81, %c0_82, %c0_83, %c0_84], %79 {strides = array<i32>} : memref<1x1x2x256xf32, #tpu.memory_space<vmem>>, vector<1x1x2x256xf32>,
    return
  }
  func.func @transform_0(%arg0: i32, %arg1: memref<4xi32, #tpu.memory_space<smem>>, %arg2: memref<4xi32, #tpu.memory_space<smem>>) -> (i32, i32, i32) {
    %0 = arith.index_cast %arg0 : i32 to index
    %1 = memref.load %arg1[%0] : memref<4xi32, #tpu.memory_space<smem>>
    %c0_i32 = arith.constant 0 : i32
    %c0_i32_0 = arith.constant 0 : i32
    %c0_i32_1 = arith.constant 0 : i32
    return %1, %c0_i32, %c0_i32_0 : i32, i32, i32
  }
  func.func @transform_1(%arg0: i32, %arg1: memref<4xi32, #tpu.memory_space<smem>>, %arg2: memref<4xi32, #tpu.memory_space<smem>>) -> (i32, i32, i32) {
    %0 = arith.index_cast %arg0 : i32 to index
    %1 = memref.load %arg1[%0] : memref<4xi32, #tpu.memory_space<smem>>
    %c0_i32 = arith.constant 0 : i32
    %c0_i32_0 = arith.constant 0 : i32
    %c0_i32_1 = arith.constant 0 : i32
    return %1, %c0_i32, %c0_i32_0 : i32, i32, i32
  }
  func.func @transform_2(%arg0: i32, %arg1: memref<4xi32, #tpu.memory_space<smem>>, %arg2: memref<4xi32, #tpu.memory_space<smem>>) -> (i32, i32, i32) {
    %0 = arith.index_cast %arg0 : i32 to index
    %1 = memref.load %arg2[%0] : memref<4xi32, #tpu.memory_space<smem>>
    %c0_i32 = arith.constant 0 : i32
    %c0_i32_0 = arith.constant 0 : i32
    %c0_i32_1 = arith.constant 0 : i32
    return %1, %c0_i32, %c0_i32_0 : i32, i32, i32
  }
  func.func @transform_3(%arg0: i32, %arg1: memref<4xi32, #tpu.memory_space<smem>>, %arg2: memref<4xi32, #tpu.memory_space<smem>>) -> (i32, i32, i32) {
    %0 = arith.index_cast %arg0 : i32 to index
    %1 = memref.load %arg2[%0] : memref<4xi32, #tpu.memory_space<smem>>
    %c0_i32 = arith.constant 0 : i32
    %c0_i32_0 = arith.constant 0 : i32
    %c0_i32_1 = arith.constant 0 : i32
    return %1, %c0_i32, %c0_i32_0 : i32, i32, i32
  }
  func.func @transform_4(%arg0: i32, %arg1: memref<4xi32, #tpu.memory_space<smem>>, %arg2: memref<4xi32, #tpu.memory_space<smem>>) -> (i32, i32, i32) {
    %0 = arith.index_cast %arg0 : i32 to index
    %1 = memref.load %arg1[%0] : memref<4xi32, #tpu.memory_space<smem>>
    %c0_i32 = arith.constant 0 : i32
    %c0_i32_0 = arith.constant 0 : i32
    %c0_i32_1 = arith.constant 0 : i32
    return %1, %c0_i32, %c0_i32_0 : i32, i32, i32
  }
  func.func @transform_5(%arg0: i32, %arg1: memref<4xi32, #tpu.memory_space<smem>>, %arg2: memref<4xi32, #tpu.memory_space<smem>>) -> (i32, i32, i32) {
    %0 = arith.index_cast %arg0 : i32 to index
    %1 = memref.load %arg1[%0] : memref<4xi32, #tpu.memory_space<smem>>
    %c0_i32 = arith.constant 0 : i32
    %c0_i32_0 = arith.constant 0 : i32
    %c0_i32_1 = arith.constant 0 : i32
    return %1, %c0_i32, %c0_i32_0 : i32, i32, i32
  }
  func.func @transform_6(%arg0: i32, %arg1: memref<4xi32, #tpu.memory_space<smem>>, %arg2: memref<4xi32, #tpu.memory_space<smem>>) -> (i32, i32, i32) {
    %0 = arith.index_cast %arg0 : i32 to index
    %1 = memref.load %arg2[%0] : memref<4xi32, #tpu.memory_space<smem>>
    %c16_i32 = arith.constant 16 : i32
    %2 = arith.addi %1, %c16_i32 : i32
    %c0_i32 = arith.constant 0 : i32
    %c0_i32_0 = arith.constant 0 : i32
    %c0_i32_1 = arith.constant 0 : i32
    return %2, %c0_i32, %c0_i32_0 : i32, i32, i32
  }
  func.func @transform_7(%arg0: i32, %arg1: memref<4xi32, #tpu.memory_space<smem>>, %arg2: memref<4xi32, #tpu.memory_space<smem>>) -> (i32, i32, i32) {
    %0 = arith.index_cast %arg0 : i32 to index
    %1 = memref.load %arg2[%0] : memref<4xi32, #tpu.memory_space<smem>>
    %c16_i32 = arith.constant 16 : i32
    %2 = arith.addi %1, %c16_i32 : i32
    %c0_i32 = arith.constant 0 : i32
    %c0_i32_0 = arith.constant 0 : i32
    %c0_i32_1 = arith.constant 0 : i32
    return %2, %c0_i32, %c0_i32_0 : i32, i32, i32
  }
  func.func @transform_8(%arg0: i32, %arg1: memref<4xi32, #tpu.memory_space<smem>>, %arg2: memref<4xi32, #tpu.memory_space<smem>>) -> (i32, i32, i32) {
    %c0_i32 = arith.constant 0 : i32
    %c0_i32_0 = arith.constant 0 : i32
    %c0_i32_1 = arith.constant 0 : i32
    %c0_i32_2 = arith.constant 0 : i32
    return %c0_i32, %c0_i32_0, %c0_i32_1 : i32, i32, i32
  }
  func.func @transform_9(%arg0: i32, %arg1: memref<4xi32, #tpu.memory_space<smem>>, %arg2: memref<4xi32, #tpu.memory_space<smem>>) -> (i32, i32) {
    %c0_i32 = arith.constant 0 : i32
    %c0_i32_0 = arith.constant 0 : i32
    %c0_i32_1 = arith.constant 0 : i32
    return %c0_i32, %c0_i32_0 : i32, i32
  }
  func.func @transform_10(%arg0: i32, %arg1: memref<4xi32, #tpu.memory_space<smem>>, %arg2: memref<4xi32, #tpu.memory_space<smem>>) -> (i32, i32) {
    %c0_i32 = arith.constant 0 : i32
    %c0_i32_0 = arith.constant 0 : i32
    %c0_i32_1 = arith.constant 0 : i32
    return %c0_i32, %c0_i32_0 : i32, i32
  }
  func.func @transform_11(%arg0: i32, %arg1: memref<4xi32, #tpu.memory_space<smem>>, %arg2: memref<4xi32, #tpu.memory_space<smem>>) -> (i32, i32) {
    %c0_i32 = arith.constant 0 : i32
    %c0_i32_0 = arith.constant 0 : i32
    %c0_i32_1 = arith.constant 0 : i32
    return %c0_i32, %c0_i32_0 : i32, i32
  }
  func.func @transform_12(%arg0: i32, %arg1: memref<4xi32, #tpu.memory_space<smem>>, %arg2: memref<4xi32, #tpu.memory_space<smem>>) -> (i32, i32, i32) {
    %c0_i32 = arith.constant 0 : i32
    %c0_i32_0 = arith.constant 0 : i32
    %c0_i32_1 = arith.constant 0 : i32
    %c0_i32_2 = arith.constant 0 : i32
    return %c0_i32, %c0_i32_0, %c0_i32_1 : i32, i32, i32
  }
  func.func @transform_13(%arg0: i32, %arg1: memref<4xi32, #tpu.memory_space<smem>>, %arg2: memref<4xi32, #tpu.memory_space<smem>>) -> (i32, i32) {
    %c0_i32 = arith.constant 0 : i32
    %c0_i32_0 = arith.constant 0 : i32
    %c0_i32_1 = arith.constant 0 : i32
    return %c0_i32, %c0_i32_0 : i32, i32
  }
  func.func @transform_14(%arg0: i32, %arg1: memref<4xi32, #tpu.memory_space<smem>>, %arg2: memref<4xi32, #tpu.memory_space<smem>>) -> (i32, i32) {
    %c0_i32 = arith.constant 0 : i32
    %c0_i32_0 = arith.constant 0 : i32
    %c0_i32_1 = arith.constant 0 : i32
    return %c0_i32, %c0_i32_0 : i32, i32
  }
  func.func @transform_15(%arg0: i32, %arg1: memref<4xi32, #tpu.memory_space<smem>>, %arg2: memref<4xi32, #tpu.memory_space<smem>>) -> (i32, i32) {
    %c0_i32 = arith.constant 0 : i32
    %c0_i32_0 = arith.constant 0 : i32
    %c0_i32_1 = arith.constant 0 : i32
    return %c0_i32, %c0_i32_0 : i32, i32
  }
  func.func @transform_16(%arg0: i32, %arg1: memref<4xi32, #tpu.memory_space<smem>>, %arg2: memref<4xi32, #tpu.memory_space<smem>>) -> (i32, i32, i32) {
    %c0_i32 = arith.constant 0 : i32
    %c0_i32_0 = arith.constant 0 : i32
    %c0_i32_1 = arith.constant 0 : i32
    %c0_i32_2 = arith.constant 0 : i32
    return %c0_i32, %c0_i32_0, %c0_i32_1 : i32, i32, i32
  }
  func.func @transform_17(%arg0: i32, %arg1: memref<4xi32, #tpu.memory_space<smem>>, %arg2: memref<4xi32, #tpu.memory_space<smem>>) -> (i32, i32) {
    %c0_i32 = arith.constant 0 : i32
    %c0_i32_0 = arith.constant 0 : i32
    %c0_i32_1 = arith.constant 0 : i32
    return %c0_i32, %c0_i32_0 : i32, i32
  }
  func.func @transform_18(%arg0: i32, %arg1: memref<4xi32, #tpu.memory_space<smem>>, %arg2: memref<4xi32, #tpu.memory_space<smem>>) -> (i32, i32) {
    %c0_i32 = arith.constant 0 : i32
    %c0_i32_0 = arith.constant 0 : i32
    %c0_i32_1 = arith.constant 0 : i32
    return %c0_i32, %c0_i32_0 : i32, i32
  }
  func.func @transform_19(%arg0: i32, %arg1: memref<4xi32, #tpu.memory_space<smem>>, %arg2: memref<4xi32, #tpu.memory_space<smem>>) -> (i32, i32) {
    %c0_i32 = arith.constant 0 : i32
    %c0_i32_0 = arith.constant 0 : i32
    %c0_i32_1 = arith.constant 0 : i32
    return %c0_i32, %c0_i32_0 : i32, i32
  }
  func.func @transform_20(%arg0: i32, %arg1: memref<4xi32, #tpu.memory_space<smem>>, %arg2: memref<4xi32, #tpu.memory_space<smem>>) -> (i32, i32, i32, i32) {
    %c0_i32 = arith.constant 0 : i32
    %c0_i32_0 = arith.constant 0 : i32
    %c0_i32_1 = arith.constant 0 : i32
    %c0_i32_2 = arith.constant 0 : i32
    return %arg0, %c0_i32, %c0_i32_0, %c0_i32_1 : i32, i32, i32, i32
  }
}

</mosaic_0001>

<bundles_post_ra>
// kernel: neighbor_info_forward.1
= control target key start
LH: loop header
LB: loop body
LE: loop exit
PB: predicated region body
PF: predicated region fallthrough
CT: control target
= control target key end

     0   :  { %s5051_s0 = inlined_call_operand.vmem [shape: s32[4], index: 0, kind: input, shape index: {}]   ;;  %s5052_s2 = inlined_call_operand.vmem [shape: f32[16,1,128], index: 2, kind: input, shape index: {}]   ;;  %s5053_s3 = inlined_call_operand.hbm [shape: f32[16,1,128], index: 3, kind: input, shape index: {}]   ;;  %s5054_s4 = inlined_call_operand.vmem [shape: f32[8,1,128], index: 4, kind: input, shape index: {}]   ;;  %s5055_s5 = inlined_call_operand.hbm [shape: f32[8,1,128], index: 5, kind: input, shape index: {}]   ;;  %s5056_s6 = inlined_call_operand.vmem [shape: f32[24,1,128], index: 6, kind: input, shape index: {}, may-alias: {6,8}]   ;;  %s5057_s7 = inlined_call_operand.vmem [shape: f32[24,1,128], index: 7, kind: input, shape index: {}, may-alias: {7,9}]   ;;  %s5058_s8 = inlined_call_operand.vmem [shape: f32[24,1,128], index: 8, kind: input, shape index: {}, may-alias: {6,8}]   ;;  %s5059_s9 = inlined_call_operand.vmem [shape: f32[24,1,128], index: 9, kind: input, shape index: {}, may-alias: {7,9}]   ;;  %s5060_s10 = inlined_call_operand.hbm [shape: f32[2,128,128], index: 10, kind: input, shape index: {}]   ;;  %s5061_s11 = inlined_call_operand.hbm [shape: f32[1,128], index: 11, kind: input, shape index: {}]   ;;  %s5062_s12 = inlined_call_operand.hbm [shape: f32[128,128], index: 12, kind: input, shape index: {}]   ;;  %s5063_s13 = inlined_call_operand.hbm [shape: f32[1,128], index: 13, kind: input, shape index: {}]   ;;  %s5064_s14 = inlined_call_operand.hbm [shape: f32[2,128,128], index: 14, kind: input, shape index: {}]   ;;  %s5065_s15 = inlined_call_operand.hbm [shape: f32[1,128], index: 15, kind: input, shape index: {}]   ;;  %s5066_s16 = inlined_call_operand.hbm [shape: f32[128,128], index: 16, kind: input, shape index: {}]   ;;  %s5067_s17 = inlined_call_operand.hbm [shape: f32[1,128], index: 17, kind: input, shape index: {}]   ;;  %s5068_s18 = inlined_call_operand.hbm [shape: f32[2,128,128], index: 18, kind: input, shape index: {}]   ;;  %s5069_s19 = inlined_call_operand.hbm [shape: f32[1,128], index: 19, kind: input, shape index: {}]   ;;  %s5070_s20 = inlined_call_operand.hbm [shape: f32[128,128], index: 20, kind: input, shape index: {}]   ;;  %s5071_s21 = inlined_call_operand.hbm [shape: f32[1,128], index: 21, kind: input, shape index: {}]   ;;  %s5072_s22 = inlined_call_operand.hbm [shape: f32[4,1,2,256], index: 22, kind: output, shape index: {}]   ;;  %s5073_s1 = inlined_call_operand.vmem [shape: s32[4], index: 1, kind: input, shape index: {}]  }
   0x1   :  { %5094 = sst [smem:[#allocation53_spill]] %s5051_s0  ;;  %s31_s0 = sshll.u32 %s5073_s1, 4  ;;  %s32_s0 = int_to_ptr.vmem [resolvable:$true] %s31_s0 }
   0x2   :  { %5095 = sst [smem:[#allocation54_spill]] %s5052_s2  ;;  %s5113_s29 = sld [smem:[#allocation53_spill]] }
   0x3   :  { %5096 = sst [smem:[#allocation55_spill]] %s5053_s3 }
   0x4   :  { %5097 = sst [smem:[#allocation56_spill]] %s5054_s4 }
   0x5   :  { %5098 = sst [smem:[#allocation57_spill]] %s5055_s5 }
   0x6   :  { %5099 = sst [smem:[#allocation58_spill]] %s5056_s6 }
   0x7   :  { %5100 = sst [smem:[#allocation59_spill]] %s5057_s7 }
   0x8   :  { %5101 = sst [smem:[#allocation60_spill]] %s5058_s8  ;;  %s27_s8 = sshll.u32 %s5113_s29, 4  ;;  %s28_s8 = int_to_ptr.vmem [resolvable:$true] %s27_s8 }
   0x9   :  { %5102 = sst [smem:[#allocation61_spill]] %s5059_s9  ;;  %s3503_s23 = scalar_lea.vmem %s28_s8, 16 }
   0xa   :  { %5103 = sst [smem:[#allocation62_spill]] %s5060_s10  ;;  %p3504_p0 = scmp.ne.s32.totalorder %s28_s8, %s3503_s23 }
   0xb   :  { %5104 = sst [smem:[#allocation63_spill]] %s5061_s11  ;;  %p3508_p1 = scmp.lt.s32.totalorder %s28_s8, %s28_s8 }
   0xc   :  { %5105 = sst [smem:[#allocation64_spill]] %s5062_s12  ;;  %p3509_p2 = scmp.lt.s32.totalorder %s3503_s23, %s3503_s23 }
   0xd   :  { %5106 = sst [smem:[#allocation65_spill]] %s5063_s13 }
   0xe   :  { %5107 = sst [smem:[#allocation66_spill]] %s5064_s14  ;;  %p3510_p3 = por %p3509_p2, %p3508_p1 }
   0xf   :  { %5108 = sst [smem:[#allocation67_spill]] %s5065_s15 }
  0x10   :  { %5109 = sst [smem:[#allocation68_spill]] %s5066_s16  ;;  %p3511_p4 = pnand %p3510_p3, %p3504_p0 }
  0x11   :  { %5110 = sst [smem:[#allocation69_spill]] %s5067_s17 }
  0x12   :  { %5111 = sst [smem:[#allocation70_spill]] %s5068_s18 }
  0x13   :  { %5112 = sst [smem:[#allocation71_spill]] %s5072_s22 }
  0x14   :  { %3514 = shalt.err (!%p3511_p4)  }
  0x15   :  { %s4073_s2 = smov [#allocation3]   ;;  %s3515_s6 = scalar_lea.vmem %s32_s0, 16 }
  0x16   :  { %30 = dma.vmem_to_smem %s28_s8, 16, %s4073_s2, [#allocation2] }
  0x17   :  { %p3516_p5 = scmp.ne.s32.totalorder %s32_s0, %s3515_s6  ;;  %p3520_p6 = scmp.lt.s32.totalorder %s32_s0, %s32_s0 }
  0x18   :  { %p3521_p7 = scmp.lt.s32.totalorder %s3515_s6, %s3515_s6 }
  0x1a   :  { %p3522_p8 = por %p3521_p7, %p3520_p6 }
  0x1c   :  { %p3523_p9 = pnand %p3522_p8, %p3516_p5 }
  0x1e   :  { %3526 = shalt.err (!%p3523_p9)  }
  0x1f   :  { %s4074_s24 = smov [#allocation4]  }
  0x20   :  { %34 = dma.vmem_to_smem %s32_s0, 16, %s4074_s24, [#allocation2] }
  0x21   :  { %3991 = dma.done.wait [#allocation2], 32 }
  0x22   :  { %3992 = vsyncadd [#allocation2], 4294967264 }
  0x23   :  { %36 = sfence }
  0x24   :  { %37 = vsyncpa [#allocation6], 0 }
  0x25   :  { %39 = vsyncpa [#allocation6 + $0x1], 0 }
  0x26   :  { %40 = vsyncpa [#allocation9], 0 }
  0x27   :  { %42 = vsyncpa [#allocation9 + $0x1], 0 }
  0x28   :  { %43 = vsyncpa [#allocation12], 0 }
  0x29   :  { %44 = vsyncpa [#allocation15], 0 }
  0x2a   :  { %45 = vsyncpa [#allocation18], 0 }
  0x2b   :  { %46 = vsyncpa [#allocation21], 0 }
  0x2c   :  { %47 = vsyncpa [#allocation24], 0 }
  0x2d   :  { %48 = vsyncpa [#allocation27], 0 }
  0x2e   :  { %49 = vsyncpa [#allocation7], 0 }
  0x2f   :  { %51 = vsyncpa [#allocation7 + $0x1], 0  ;;  %s4216_s1 = smov 0   ;;  %s4218_s8 = smov 0  }
  0x30   :  { %s4220_s7 = smov 0   ;;  %s4222_s25 = smov 0  }
  0x31   :  { %s4224_s26 = smov 0   ;;  %s4226_s3 = smov 0  }
  0x32   :  { %s4228_s27 = smov 0   ;;  %s4230_s4 = smov 0  }
  0x33   :  { %s4232_s28 = smov 0   ;;  %s4234_s29 = smov 0  }
  0x34 LB: > { %5114 = sst [smem:[#allocation44_spill]] %s4035_s1  ;;  %s4075_s30 = smov [#allocation10]   ;;  %s4071_s29 = sphi %s4234_s29, %s5200_s29   ;;  %s4067_s28 = sphi %s4232_s28, %s5199_s28   ;;  %s4063_s4 = sphi %s4230_s4, %s5198_s4   ;;  %s4059_s27 = sphi %s4228_s27, %s5197_s27   ;;  %s4055_s3 = sphi %s4226_s3, %s5196_s3   ;;  %s4051_s26 = sphi %s4224_s26, %s5194_s26   ;;  %s4047_s25 = sphi %s4222_s25, %s5193_s25   ;;  %s4043_s7 = sphi %s4220_s7, %s5195_s7   ;;  %s4039_s8 = sphi %s4218_s8, %s5192_s8   ;;  %s4035_s1 = sphi %s4216_s1, %s5191_s1  }
  0x35   : > { %5115 = sst [smem:[#allocation45_spill]] %s4039_s8  ;;  %s580_s5 = sshll.u32 %s4075_s30, 4  ;;  %s4272_s5 = int_to_ptr.vmem [resolvable:$true] %s580_s5 }
  0x36   : > { %5116 = sst [smem:[#allocation46_spill]] %s4043_s7  ;;  %s4267_s0 = sadd.s32 4294967295, %s4071_s29  }
  0x37   : > { %5117 = sst [smem:[#allocation47_spill]] %s4047_s25  ;;  %p2303_p10 = scmp.ge.s32.totalorder %s4071_s29, 1 }
  0x38   : > { %5118 = sst [smem:[#allocation48_spill]] %s4051_s26  ;;  %p5088_p11 = scmp.eq.s32.totalorder %s4267_s0, 0 }
  0x39   : > { %5119 = sst [smem:[#allocation49_spill]] %s4055_s3  ;;  %p568_p12 = scmp.lt.s32.totalorder %s4071_s29, 5 }
  0x3a   : > { %5120 = sst [smem:[#allocation50_spill]] %s4059_s27  ;;  %s4076_s2 = smov [#allocation11]  }
  0x3b   : > { %5121 = sst [smem:[#allocation51_spill]] %s4267_s0  ;;  %p4274_p13 = pnand %p2303_p10, %p568_p12 }
  0x3c   : > { %s594_s6 = sshll.u32 %s4076_s2, 4  ;;  %s4077_s30 = smov [#allocation14]   ;;  %s4286_s6 = int_to_ptr.vmem [resolvable:$true] %s594_s6 }
  0x3d   : > { %s5122_s23 = scalar_select %p4274_p13, 1, 0 }
  0x3e   : > { %p3310_p0 = pneg %p4274_p13  ;;  %s618_s22 = sshll.u32 %s4077_s30, 4  ;;  %s4288_s22 = int_to_ptr.vmem [resolvable:$true] %s618_s22 }
  0x3f   : > { %5123 = sst [smem:[#allocation52_spill]] %s5122_s23  ;;  %s5125_s10 = sld [smem:[#allocation62_spill]] }
  0x40   : > { %p4282_p1 = pnand %p3310_p0, %p5088_p11 }
  0x42   : > { %p4298_p3 = pneg %p4282_p1 }
  0x45   : > { %s3527_s3 = scalar_lea.hbm %s5125_s10, 4096 }
  0x46   : > { %p3528_p2 = scmp.ne.s32.totalorder %s5125_s10, %s3527_s3  ;;  %p3534_p6 = scmp.lt.u32.totalorder %s3527_s3, %s5125_s10 }
  0x48   : > { %p3530_p4 = pnand %p4298_p3, %p3528_p2 }
  0x4a   : > { %p3531_p5 = pneg %p3530_p4 }
  0x4c   : > { %p3536_p7 = pnand %p3534_p6, %p3531_p5 }
  0x4e   : > { %3539 = shalt.err (!%p3536_p7)
}
  0x4f   : > { %s3540_s9 = scalar_lea.vmem %s4272_s5, 4096  ;;  %p3548_p12 = scmp.lt.s32.totalorder %s4272_s5, %s4272_s5 }
  0x50   : > { %p3541_p8 = scmp.ne.s32.totalorder %s4272_s5, %s3540_s9  ;;  %p3549_p0 = scmp.lt.s32.totalorder %s3540_s9, %s3540_s9 }
  0x52   : > { %p3543_p9 = pnand %p3541_p8, %p4298_p3  ;;  %p3550_p2 = por %p3549_p0, %p3548_p12 }
  0x54   : > { %p3544_p10 = pneg %p3543_p9 }
  0x56   : > { %p3551_p4 = pnand %p3550_p2, %p3544_p10 }
  0x58   : > { %3554 = shalt.err (!%p3551_p4)
}
  0x59   : > { %s5086_s25 = smov 128   ;;  %s4079_s1 = smov 8  }
  0x5a   : > { %3313 = dma.hbm_to_vmem [thread:$0]  (!%p4282_p1), %s5125_s10, 4096, %s4272_s5, [#allocation9], %s5086_s25, %s5086_s25, %s4079_s1  }
  0x5b   : > { %s5127_s11 = sld [smem:[#allocation63_spill]] }
  0x61   : > { %s3555_s9 = scalar_lea.hbm %s5127_s11, 16 }
  0x62   : > { %p3556_p5 = scmp.ne.s32.totalorder %s5127_s11, %s3555_s9  ;;  %p3562_p8 = scmp.lt.u32.totalorder %s3555_s9, %s5127_s11 }
  0x64   : > { %p3558_p6 = pnand %p3556_p5, %p4298_p3 }
  0x66   : > { %p3559_p7 = pneg %p3558_p6 }
  0x68   : > { %p3564_p9 = pnand %p3562_p8, %p3559_p7 }
  0x6a   : > { %3567 = shalt.err (!%p3564_p9)
}
  0x6b   : > { %s3568_s5 = scalar_lea.vmem %s4286_s6, 16  ;;  %s3575_s8 = scalar_lea.vmem %s4286_s6, 32 }
  0x6c   : > { %p3569_p10 = scmp.ne.s32.totalorder %s4286_s6, %s3568_s5  ;;  %p3576_p2 = scmp.lt.s32.totalorder %s4286_s6, %s4286_s6 }
  0x6d   : > { %p3577_p4 = scmp.lt.s32.totalorder %s3575_s8, %s3568_s5 }
  0x6e   : > { %p3571_p12 = pnand %p3569_p10, %p4298_p3 }
  0x6f   : > { %p3578_p5 = por %p3577_p4, %p3576_p2 }
  0x70   : > { %p3572_p0 = pneg %p3571_p12 }
  0x72   : > { %p3579_p6 = pnand %p3578_p5, %p3572_p0 }
  0x74   : > { %3582 = shalt.err (!%p3579_p6)
}
  0x75   : > { %3316 = dma.hbm_to_vmem [thread:$0]  (!%p4282_p1), %s5127_s11, 16, %s4286_s6, [#allocation12]  }
  0x76   : > { %s5128_s13 = sld [smem:[#allocation65_spill]] }
  0x7c   : > { %s3583_s3 = scalar_lea.hbm %s5128_s13, 16 }
  0x7d   : > { %p3584_p7 = scmp.ne.s32.totalorder %s5128_s13, %s3583_s3  ;;  %p3590_p10 = scmp.lt.u32.totalorder %s3583_s3, %s5128_s13 }
  0x7f   : > { %p3586_p8 = pnand %p3584_p7, %p4298_p3 }
  0x81   : > { %p3587_p9 = pneg %p3586_p8 }
  0x83   : > { %p3592_p12 = pnand %p3590_p10, %p3587_p9 }
  0x85   : > { %3595 = shalt.err (!%p3592_p12)
}
  0x86   : > { %s3596_s6 = scalar_lea.vmem %s4288_s22, 16  ;;  %s3603_s8 = scalar_lea.vmem %s4288_s22, 32 }
  0x87   : > { %p3597_p0 = scmp.ne.s32.totalorder %s4288_s22, %s3596_s6  ;;  %p3604_p5 = scmp.lt.s32.totalorder %s4288_s22, %s4288_s22 }
  0x88   : > { %p3605_p6 = scmp.lt.s32.totalorder %s3603_s8, %s3596_s6 }
  0x89   : > { %p3599_p2 = pnand %p3597_p0, %p4298_p3 }
  0x8a   : > { %p3606_p7 = por %p3605_p6, %p3604_p5 }
  0x8b   : > { %p3600_p4 = pneg %p3599_p2 }
  0x8d   : > { %p3607_p8 = pnand %p3606_p7, %p3600_p4 }
  0x8f   : > { %3610 = shalt.err (!%p3607_p8)
}
  0x90   : > { %3322 = dma.hbm_to_vmem [thread:$0]  (!%p4282_p1), %s5128_s13, 16, %s4288_s22, [#allocation15]  }
  0x91   : > { %s4080_s0 = smov [#allocation17]   ;;  %s4081_s3 = smov [#allocation20]  }
  0x92   : > { %s642_s26 = sshll.u32 %s4080_s0, 4  ;;  %s666_s23 = sshll.u32 %s4081_s3, 4  ;;  %s643_s26 = int_to_ptr.vmem [resolvable:$true] %s642_s26  ;;  %s667_s23 = int_to_ptr.vmem [resolvable:$true] %s666_s23 }
  0x93   : > { %s5129_s15 = sld [smem:[#allocation67_spill]] }
  0x99   : > { %s3611_s5 = scalar_lea.hbm %s5129_s15, 16 }
  0x9a   : > { %p3612_p9 = scmp.ne.s32.totalorder %s5129_s15, %s3611_s5  ;;  %p3618_p0 = scmp.lt.u32.totalorder %s3611_s5, %s5129_s15 }
  0x9c   : > { %p3614_p10 = pnand %p3612_p9, %p4298_p3 }
  0x9e   : > { %p3615_p12 = pneg %p3614_p10 }
  0xa0   : > { %p3620_p2 = pnand %p3618_p0, %p3615_p12 }
  0xa2   : > { %3623 = shalt.err (!%p3620_p2)
}
  0xa3   : > { %s3624_s22 = scalar_lea.vmem %s643_s26, 16  ;;  %s3631_s27 = scalar_lea.vmem %s643_s26, 32 }
  0xa4   : > { %p3625_p4 = scmp.ne.s32.totalorder %s643_s26, %s3624_s22  ;;  %p3632_p7 = scmp.lt.s32.totalorder %s643_s26, %s643_s26 }
  0xa5   : > { %p3633_p8 = scmp.lt.s32.totalorder %s3631_s27, %s3624_s22 }
  0xa6   : > { %p3627_p5 = pnand %p3625_p4, %p4298_p3 }
  0xa7   : > { %p3634_p11 = por %p3633_p8, %p3632_p7 }
  0xa8   : > { %p3628_p6 = pneg %p3627_p5 }
  0xaa   : > { %p3635_p13 = pnand %p3634_p11, %p3628_p6 }
  0xac   : > { %3638 = shalt.err (!%p3635_p13)
}
  0xad   : > { %3328 = dma.hbm_to_vmem [thread:$0]  (!%p4282_p1), %s5129_s15, 16, %s643_s26, [#allocation18]  }
  0xae   : > { %s5130_s17 = sld [smem:[#allocation69_spill]] }
  0xb4   : > { %s3639_s9 = scalar_lea.hbm %s5130_s17, 16 }
  0xb5   : > { %p3640_p9 = scmp.ne.s32.totalorder %s5130_s17, %s3639_s9  ;;  %p3646_p13 = scmp.lt.u32.totalorder %s3639_s9, %s5130_s17 }
  0xb7   : > { %p3642_p10 = pnand %p3640_p9, %p4298_p3 }
  0xb9   : > { %p3643_p11 = pneg %p3642_p10 }
  0xbb   : > { %p3648_p12 = pnand %p3646_p13, %p3643_p11 }
  0xbd   : > { %3651 = shalt.err (!%p3648_p12)
}
  0xbe   : > { %s3652_s22 = scalar_lea.vmem %s667_s23, 16  ;;  %s3659_s26 = scalar_lea.vmem %s667_s23, 32 }
  0xbf   : > { %p3653_p0 = scmp.ne.s32.totalorder %s667_s23, %s3652_s22  ;;  %p3660_p5 = scmp.lt.s32.totalorder %s667_s23, %s667_s23 }
  0xc0   : > { %p3661_p6 = scmp.lt.s32.totalorder %s3659_s26, %s3652_s22 }
  0xc1   : > { %p3655_p2 = pnand %p3653_p0, %p4298_p3 }
  0xc2   : > { %p3662_p7 = por %p3661_p6, %p3660_p5 }
  0xc3   : > { %p3656_p4 = pneg %p3655_p2 }
  0xc5   : > { %p3663_p8 = pnand %p3662_p7, %p3656_p4 }
  0xc7   : > { %3666 = shalt.err (!%p3663_p8)
}
  0xc8   : > { %3334 = dma.hbm_to_vmem [thread:$0]  (!%p4282_p1), %s5130_s17, 16, %s667_s23, [#allocation21]  }
  0xc9   : > { %s4082_s3 = smov [#allocation23]   ;;  %s4083_s30 = smov [#allocation13]  }
  0xca   : > { %s690_s25 = sshll.u32 %s4082_s3, 4  ;;  %s604_s9 = sshll.u32 %s4083_s30, 4  ;;  %s691_s25 = int_to_ptr.vmem [resolvable:$true] %s690_s25  ;;  %s605_s9 = int_to_ptr.vmem [resolvable:$true] %s604_s9 }
  0xcb   : > { %s3667_s8 = scalar_lea.hbm %s5069_s19, 16 }
  0xcc   : > { %p3668_p9 = scmp.ne.s32.totalorder %s5069_s19, %s3667_s8  ;;  %p3674_p13 = scmp.lt.u32.totalorder %s3667_s8, %s5069_s19 }
  0xce   : > { %p3670_p10 = pnand %p3668_p9, %p4298_p3 }
  0xd0   : > { %p3671_p11 = pneg %p3670_p10 }
  0xd2   : > { %p3676_p12 = pnand %p3674_p13, %p3671_p11 }
  0xd4   : > { %3679 = shalt.err (!%p3676_p12)
}
  0xd5   : > { %s3680_s23 = scalar_lea.vmem %s691_s25, 16  ;;  %s3687_s0 = scalar_lea.vmem %s691_s25, 32 }
  0xd6   : > { %p3681_p0 = scmp.ne.s32.totalorder %s691_s25, %s3680_s23  ;;  %p3688_p5 = scmp.lt.s32.totalorder %s691_s25, %s691_s25 }
  0xd7   : > { %p3689_p6 = scmp.lt.s32.totalorder %s3687_s0, %s3680_s23 }
  0xd8   : > { %p3683_p2 = pnand %p3681_p0, %p4298_p3 }
  0xd9   : > { %p3690_p7 = por %p3689_p6, %p3688_p5 }
  0xda   : > { %p3684_p4 = pneg %p3683_p2 }
  0xdc   : > { %p3691_p8 = pnand %p3690_p7, %p3684_p4 }
  0xde   : > { %3694 = shalt.err (!%p3691_p8)
}
  0xdf   : > { %3340 = dma.hbm_to_vmem [thread:$0]  (!%p4282_p1), %s5069_s19, 16, %s691_s25, [#allocation24]  }
  0xe0   : > { %s5131_s12 = sld [smem:[#allocation64_spill]] }
  0xe6   : > { %s3695_s8 = scalar_lea.hbm %s5131_s12, 2048 }
  0xe7   : > { %p3696_p9 = scmp.ne.s32.totalorder %s5131_s12, %s3695_s8  ;;  %p3702_p13 = scmp.lt.u32.totalorder %s3695_s8, %s5131_s12 }
  0xe9   : > { %p3698_p10 = pnand %p3696_p9, %p4298_p3 }
  0xeb   : > { %p3699_p11 = pneg %p3698_p10 }
  0xed   : > { %p3704_p12 = pnand %p3702_p13, %p3699_p11 }
  0xef   : > { %3707 = shalt.err (!%p3704_p12)
}
  0xf0   : > { %s3708_s23 = scalar_lea.vmem %s605_s9, 2048  ;;  %p3716_p5 = scmp.lt.s32.totalorder %s605_s9, %s605_s9 }
  0xf1   : > { %p3709_p0 = scmp.ne.s32.totalorder %s605_s9, %s3708_s23  ;;  %p3717_p6 = scmp.lt.s32.totalorder %s3708_s23, %s3708_s23 }
  0xf3   : > { %p3711_p2 = pnand %p3709_p0, %p4298_p3  ;;  %p3718_p7 = por %p3717_p6, %p3716_p5 }
  0xf5   : > { %p3712_p4 = pneg %p3711_p2 }
  0xf7   : > { %p3719_p8 = pnand %p3718_p7, %p3712_p4 }
  0xf9   : > { %3722 = shalt.err (!%p3719_p8)
}
  0xfa   : > { %s5132_s25 = smov 128   ;;  %s4084_s30 = smov [#allocation16]  }
  0xfb   : > { %3319 = dma.hbm_to_vmem [thread:$0]  (!%p4282_p1), %s5131_s12, 2048, %s605_s9, [#allocation12], %s5132_s25, %s5132_s25, %s4079_s1  }
  0xfc   : > { %s628_s5 = sshll.u32 %s4084_s30, 4  ;;  %s4085_s6 = smov [#allocation19]   ;;  %s629_s5 = int_to_ptr.vmem [resolvable:$true] %s628_s5 }
  0xfd   : > { %s652_s8 = sshll.u32 %s4085_s6, 4  ;;  %s5133_s14 = sld [smem:[#allocation66_spill]]  ;;  %s653_s8 = int_to_ptr.vmem [resolvable:$true] %s652_s8 }
 0x103   : > { %s3723_s26 = scalar_lea.hbm %s5133_s14, 4096 }
 0x104   : > { %p3724_p9 = scmp.ne.s32.totalorder %s5133_s14, %s3723_s26  ;;  %p3730_p13 = scmp.lt.u32.totalorder %s3723_s26, %s5133_s14 }
 0x106   : > { %p3726_p10 = pnand %p3724_p9, %p4298_p3 }
 0x108   : > { %p3727_p11 = pneg %p3726_p10 }
 0x10a   : > { %p3732_p12 = pnand %p3730_p13, %p3727_p11 }
 0x10c   : > { %3735 = shalt.err (!%p3732_p12)
}
 0x10d   : > { %s3736_s9 = scalar_lea.vmem %s629_s5, 4096  ;;  %p3744_p5 = scmp.lt.s32.totalorder %s629_s5, %s629_s5 }
 0x10e   : > { %p3737_p0 = scmp.ne.s32.totalorder %s629_s5, %s3736_s9  ;;  %p3745_p6 = scmp.lt.s32.totalorder %s3736_s9, %s3736_s9 }
 0x110   : > { %p3739_p2 = pnand %p3737_p0, %p4298_p3  ;;  %p3746_p7 = por %p3745_p6, %p3744_p5 }
 0x112   : > { %p3740_p4 = pneg %p3739_p2 }
 0x114   : > { %p3747_p8 = pnand %p3746_p7, %p3740_p4 }
 0x116   : > { %3750 = shalt.err (!%p3747_p8)
}
 0x117   : > { %3325 = dma.hbm_to_vmem [thread:$0]  (!%p4282_p1), %s5133_s14, 4096, %s629_s5, [#allocation15], %s5132_s25, %s5132_s25, %s4079_s1  }
 0x118   : > { %s5134_s16 = sld [smem:[#allocation68_spill]] }
 0x11e   : > { %s3751_s7 = scalar_lea.hbm %s5134_s16, 2048 }
 0x11f   : > { %p3752_p9 = scmp.ne.s32.totalorder %s5134_s16, %s3751_s7  ;;  %p3758_p13 = scmp.lt.u32.totalorder %s3751_s7, %s5134_s16 }
 0x121   : > { %p3754_p10 = pnand %p3752_p9, %p4298_p3 }
 0x123   : > { %p3755_p11 = pneg %p3754_p10 }
 0x125   : > { %p3760_p12 = pnand %p3758_p13, %p3755_p11 }
 0x127   : > { %3763 = shalt.err (!%p3760_p12)
}
 0x128   : > { %s3764_s0 = scalar_lea.vmem %s653_s8, 2048  ;;  %p3772_p5 = scmp.lt.s32.totalorder %s653_s8, %s653_s8 }
 0x129   : > { %p3765_p0 = scmp.ne.s32.totalorder %s653_s8, %s3764_s0  ;;  %p3773_p6 = scmp.lt.s32.totalorder %s3764_s0, %s3764_s0 }
 0x12b   : > { %p3767_p2 = pnand %p3765_p0, %p4298_p3  ;;  %p3774_p7 = por %p3773_p6, %p3772_p5 }
 0x12d   : > { %p3768_p4 = pneg %p3767_p2 }
 0x12f   : > { %p3775_p8 = pnand %p3774_p7, %p3768_p4 }
 0x131   : > { %3778 = shalt.err (!%p3775_p8)
}
 0x132   : > { %3331 = dma.hbm_to_vmem [thread:$0]  (!%p4282_p1), %s5134_s16, 2048, %s653_s8, [#allocation18], %s5132_s25, %s5132_s25, %s4079_s1  }
 0x133   : > { %s4086_s10 = smov [#allocation22]   ;;  %s4087_s30 = smov [#allocation25]  }
 0x134   : > { %s676_s3 = sshll.u32 %s4086_s10, 4  ;;  %s700_s6 = sshll.u32 %s4087_s30, 4  ;;  %s677_s3 = int_to_ptr.vmem [resolvable:$true] %s676_s3  ;;  %s701_s6 = int_to_ptr.vmem [resolvable:$true] %s700_s6 }
 0x135   : > { %s5135_s18 = sld [smem:[#allocation70_spill]] }
 0x13b   : > { %s3779_s26 = scalar_lea.hbm %s5135_s18, 4096 }
 0x13c   : > { %p3780_p9 = scmp.ne.s32.totalorder %s5135_s18, %s3779_s26  ;;  %p3786_p13 = scmp.lt.u32.totalorder %s3779_s26, %s5135_s18 }
 0x13e   : > { %p3782_p10 = pnand %p3780_p9, %p4298_p3 }
 0x140   : > { %p3783_p11 = pneg %p3782_p10 }
 0x142   : > { %p3788_p12 = pnand %p3786_p13, %p3783_p11 }
 0x144   : > { %3791 = shalt.err (!%p3788_p12)
}
 0x145   : > { %s3792_s8 = scalar_lea.vmem %s677_s3, 4096  ;;  %p3800_p5 = scmp.lt.s32.totalorder %s677_s3, %s677_s3 }
 0x146   : > { %p3793_p0 = scmp.ne.s32.totalorder %s677_s3, %s3792_s8  ;;  %p3801_p6 = scmp.lt.s32.totalorder %s3792_s8, %s3792_s8 }
 0x148   : > { %p3795_p2 = pnand %p3793_p0, %p4298_p3  ;;  %p3802_p7 = por %p3801_p6, %p3800_p5 }
 0x14a   : > { %p3796_p4 = pneg %p3795_p2 }
 0x14c   : > { %p3803_p8 = pnand %p3802_p7, %p3796_p4 }
 0x14e   : > { %3806 = shalt.err (!%p3803_p8)
}
 0x14f   : > { %3337 = dma.hbm_to_vmem [thread:$0]  (!%p4282_p1), %s5135_s18, 4096, %s677_s3, [#allocation21], %s5132_s25, %s5132_s25, %s4079_s1  }
 0x150   : > { %s3807_s22 = scalar_lea.hbm %s5070_s20, 2048 }
 0x151   : > { %p3808_p9 = scmp.ne.s32.totalorder %s5070_s20, %s3807_s22  ;;  %p3814_p13 = scmp.lt.u32.totalorder %s3807_s22, %s5070_s20 }
 0x153   : > { %p3810_p10 = pnand %p3808_p9, %p4298_p3 }
 0x155   : > { %p3811_p11 = pneg %p3810_p10 }
 0x157   : > { %p3816_p12 = pnand %p3814_p13, %p3811_p11 }
 0x159   : > { %3819 = shalt.err (!%p3816_p12)
}
 0x15a   : > { %s3820_s5 = scalar_lea.vmem %s701_s6, 2048  ;;  %p3828_p5 = scmp.lt.s32.totalorder %s701_s6, %s701_s6 }
 0x15b   : > { %p3821_p0 = scmp.ne.s32.totalorder %s701_s6, %s3820_s5  ;;  %p3829_p6 = scmp.lt.s32.totalorder %s3820_s5, %s3820_s5 }
 0x15d   : > { %p3823_p2 = pnand %p3821_p0, %p4298_p3  ;;  %p3830_p7 = por %p3829_p6, %p3828_p5 }
 0x15f   : > { %p3824_p4 = pneg %p3823_p2 }
 0x161   : > { %p3831_p8 = pnand %p3830_p7, %p3824_p4 }
 0x163   : > { %3834 = shalt.err (!%p3831_p8)
}
 0x164   : > { %3343 = dma.hbm_to_vmem [thread:$0]  (!%p4282_p1), %s5070_s20, 2048, %s701_s6, [#allocation24], %s5132_s25, %s5132_s25, %s4079_s1  }
 0x165   : > { %s4088_s9 = smov [#allocation26]   ;;  %s3835_s22 = scalar_lea.hbm %s5071_s21, 16 }
 0x166   : > { %s714_s10 = sshll.u32 %s4088_s9, 4  ;;  %p3836_p9 = scmp.ne.s32.totalorder %s5071_s21, %s3835_s22  ;;  %s715_s10 = int_to_ptr.vmem [resolvable:$true] %s714_s10 }
 0x167   : > { %p3842_p13 = scmp.lt.u32.totalorder %s3835_s22, %s5071_s21 }
 0x168   : > { %p3838_p10 = pnand %p3836_p9, %p4298_p3 }
 0x16a   : > { %p3839_p11 = pneg %p3838_p10 }
 0x16c   : > { %p3844_p12 = pnand %p3842_p13, %p3839_p11 }
 0x16e   : > { %3847 = shalt.err (!%p3844_p12)
}
 0x16f   : > { %s3848_s1 = scalar_lea.vmem %s715_s10, 16  ;;  %s3855_s25 = scalar_lea.vmem %s715_s10, 32 }
 0x170   : > { %p3849_p0 = scmp.ne.s32.totalorder %s715_s10, %s3848_s1  ;;  %p3856_p5 = scmp.lt.s32.totalorder %s715_s10, %s715_s10 }
 0x171   : > { %p3857_p6 = scmp.lt.s32.totalorder %s3855_s25, %s3848_s1 }
 0x172   : > { %p3851_p2 = pnand %p3849_p0, %p4298_p3 }
 0x173   : > { %p3858_p7 = por %p3857_p6, %p3856_p5 }
 0x174   : > { %p3852_p4 = pneg %p3851_p2 }
 0x176   : > { %p3859_p8 = pnand %p3858_p7, %p3852_p4 }
 0x178   : > { %3862 = shalt.err (!%p3859_p8)
}
 0x179   : > { %s5136_s2 = sld [smem:[#allocation50_spill]]  ;;  %s5137_s3 = sld [smem:[#allocation46_spill]] }
 0x17a   : > { %s5138_s8 = sld [smem:[#allocation51_spill]]  ;;  %s5139_s9 = sld [smem:[#allocation45_spill]] }
 0x17b   : > { %3346 = dma.hbm_to_vmem [thread:$0]  (!%p4282_p1), %s5071_s21, 16, %s715_s10, [#allocation27]  }
 0x17c   : > { %s2302_s24 = sadd.s32 4294967294, %s4071_s29   ;;  %s4549_s30 = sadd.s32 1, %s4071_s29  }
 0x17d   : > { %s5140_s7 = sld [smem:[#allocation44_spill]]  ;;  %s94_s27 = sadd.s32 1, %s4067_s28 }
 0x17e   : > { %s89_s22 = sld [smem:[#allocation3 + %s4071_s29]]  ;;  %p101_p3 = scmp.ne.s32.totalorder %s4067_s28, %s4063_s4 }
 0x17f   : > { %s90_s26 = sld [smem:[#allocation3 + %s4549_s30]]  ;;  %p5091_p9 = scmp.eq.s32.totalorder %s4071_s29, 0 }
 0x180   : > { %p107_p10 = scmp.ne.s32.totalorder %s4063_s4, %s5136_s2  ;;  %s541_s23 = ssub.s32 %s4071_s29, %s4549_s30 }
 0x181   : > { %s544_s10 = sadd.s32 1, %s5137_s3  ;;  %p4564_p1 = por %p5091_p9, %p101_p3 }
 0x182   : > { %p5142_p11 = scmp.eq.s32.totalorder %s5138_s8, 0  ;;  %p542_p12 = scmp.eq.s32.totalorder %s541_s23, 0 }
 0x183   : > { %p554_p0 = scmp.ne.s32.totalorder %s5137_s3, %s5139_s9  ;;  %p555_p2 = scmp.eq.s32.totalorder %s5138_s8, 3 }
 0x184   : > { %p4570_p13 = por %p5142_p11, %p107_p10  ;;  %p560_p5 = scmp.ne.s32.totalorder %s5139_s9, %s5140_s7 }
 0x185   : > { %s91_s25 = ssub.s32 %s89_s22, %s90_s26  ;;  %s5202_s3 = smov (!%p542_p12, %s5137_s3), %s544_s10 }
 0x186   : > { %p92_p4 = scmp.eq.s32.totalorder %s91_s25, 0  ;;  %p4585_p6 = por %p555_p2, %p554_p0 }
 0x187   : > { %s5145_s2 = sld [smem:[#allocation48_spill]]  ;;  %s5146_s11 = sld [smem:[#allocation49_spill]] }
 0x188   : > { %s4583_s6 = scalar_select %p92_p4, %s4067_s28, %s94_s27  }
 0x189   : > { %s5144_s5 = scalar_select %p4585_p6, 1, 0 }
 0x18a   : > { %p561_p7 = scmp.eq.s32.totalorder %s2302_s24, 3  ;;  %p5090_p8 = scmp.lt.s32.totalorder %s4071_s29, 4 }
 0x18b   : > { %s5147_s23 = sld [smem:[#allocation47_spill]]  ;;  %s733_s22 = sand.u32 1, %s4067_s28  }
 0x18c   : > { %p4591_p3 = por %p561_p7, %p560_p5  ;;  %p4599_p10 = pnand %p5090_p8, %p4564_p1 }
 0x18d   : > { %s3276_s7 = scalar_select %p4564_p1, [#allocation3], [#allocation29] }
 0x18e   : > { %s5148_s26 = scalar_select %p4591_p3, 1, 0 }
 0x18f   : > { %s3277_s27 = scalar_select %p4564_p1, %s4071_s29, 0 }
 0x190   : > { %s5204_s7 = smov (!%p5090_p8, %s3276_s7), [#allocation31]  ;;  %s736_s10 = scalar_lea.vmem [#allocation5], %s733_s22 }
 0x191   : > { %s5206_s27 = smov (!%p5090_p8, %s3277_s27), 0  ;;  %s744_s25 = sshll.u32 %s736_s10, 4  ;;  %s4618_s25 = int_to_ptr.vmem [resolvable:$true] %s744_s25 }
 0x192   : > { %s737_s24 = sld [smem:[%s5204_s7 + %s5206_s27]]  ;;  %s734_s7 = scalar_lea.sflag [#allocation6], %s733_s22 }
 0x193   : > { %s4613_s12 = sld [smem:[#allocation4 + %s4071_s29]]  ;;  %p3865_p0 = pneg %p4599_p10 }
 0x194   : > { %s4616_s13 = sld [smem:[#allocation4 + %s4549_s30]] }
 0x195   : > { %s5150_s16 = sld [smem:[#allocation55_spill]] }
 0x198   : > { %s2317_s14 = sshll.u32 %s737_s24, 4 }
 0x19b   : > { %s4627_s17 = scalar_lea.hbm %s5150_s16, %s2317_s14  ;;  %s3868_s18 = scalar_lea.hbm %s5150_s16, 256 }
 0x19c   : > { %s3863_s27 = scalar_lea.hbm %s4627_s17, 16  ;;  %p3869_p5 = scmp.lt.u32.totalorder %s4627_s17, %s5150_s16 }
 0x19d   : > { %p3864_p1 = scmp.ne.s32.totalorder %s4627_s17, %s3863_s27  ;;  %p3870_p7 = scmp.lt.u32.totalorder %s3868_s18, %s3863_s27 }
 0x19e   : > { %p3872_p11 = scmp.lt.u32.totalorder %s3863_s27, %s4627_s17 }
 0x19f   : > { %p3866_p2 = pnand %p3865_p0, %p3864_p1  ;;  %p3871_p8 = por %p3870_p7, %p3869_p5 }
 0x1a1   : > { %p3867_p4 = pneg %p3866_p2  ;;  %p3873_p9 = por %p3872_p11, %p3871_p8 }
 0x1a3   : > { %p3874_p12 = pnand %p3873_p9, %p3867_p4 }
 0x1a5   : > { %3877 = shalt.err (!%p3874_p12)
}
 0x1a6   : > { %s3878_s22 = scalar_lea.vmem %s4618_s25, 16  ;;  %s4089_s0 = smov [#allocation5]  }
 0x1a7   : > { %p3879_p1 = scmp.ne.s32.totalorder %s4618_s25, %s3878_s22  ;;  %s3883_s24 = sshll.u32 %s4089_s0, 4  ;;  %s3884_s24 = int_to_ptr.vmem [resolvable:$false] %s3883_s24 }
 0x1a8   : > { %s3885_s10 = scalar_lea.vmem %s3884_s24, 32  ;;  %p3886_p6 = scmp.lt.s32.totalorder %s4618_s25, %s3884_s24 }
 0x1a9   : > { %p3881_p2 = pnand %p3879_p1, %p3865_p0  ;;  %p3887_p5 = scmp.lt.s32.totalorder %s3885_s10, %s3878_s22 }
 0x1ab   : > { %p3882_p3 = pneg %p3881_p2  ;;  %p3888_p7 = por %p3887_p5, %p3886_p6 }
 0x1ad   : > { %p3889_p8 = pnand %p3888_p7, %p3882_p3 }
 0x1af   : > { %3892 = shalt.err (!%p3889_p8)
}
 0x1b0   : > { %3352 = dma.hbm_to_vmem [thread:$0]  (!%p4599_p10), %s4627_s17, 16, %s4618_s25, %s734_s7  }
 0x1b1   : > { %s150_s18 = sadd.s32 1, %s5146_s11  ;;  %p5151_p9 = scmp.eq.s32.totalorder %s5138_s8, 0 }
 0x1b2   : > { %p5152_p6 = scmp.ne.s32.totalorder %s5145_s2, %s5147_s23  ;;  %s147_s27 = ssub.s32 %s4613_s12, %s4616_s13 }
 0x1b3   : > { %p5154_p11 = scmp.eq.s32.totalorder %s4071_s29, 0  ;;  %p5155_p12 = scmp.ne.s32.totalorder %s5146_s11, %s5145_s2 }
 0x1b4   : > { %p4660_p3 = por %p5152_p6, %p5151_p9  ;;  %p148_p4 = scmp.eq.s32.totalorder %s147_s27, 0 }
 0x1b5   : > { %p159_p0 = por %p5155_p12, %p5154_p11  ;;  %s761_s15 = sand.u32 1, %s5146_s11  }
 0x1b6   : > { %s5153_s9 = scalar_select %p4660_p3, 1, 0 }
 0x1b7   : > { %p5156_p1 = scmp.lt.s32.totalorder %s4071_s29, 4  ;;  %s5208_s11 = smov (!%p148_p4, %s5146_s11), %s150_s18 }
 0x1b8   : > { %s3279_s17 = scalar_select %p159_p0, [#allocation4], [#allocation30] }
 0x1b9   : > { %p4674_p2 = pnand %p5156_p1, %p159_p0  ;;  %p5158_p10 = pmov %p5156_p1 }
 0x1ba   : > { %s3280_s8 = scalar_select %p159_p0, %s4071_s29, 0 }
 0x1bb   : > { %s5210_s17 = smov (!%p5158_p10, %s3279_s17), [#allocation32]  ;;  %p5159_p5 = pmov %p5156_p1 }
 0x1bc   : > { %s759_s13 = sand.u32 1, %s4071_s29   ;;  %s762_s2 = scalar_lea.vmem [#allocation8], %s761_s15 }
 0x1bd   : > { %s5212_s8 = smov (!%p5159_p5, %s3280_s8), 0  ;;  %s770_s23 = sshll.u32 %s762_s2, 4  ;;  %s4687_s23 = int_to_ptr.vmem [resolvable:$true] %s770_s23 }
 0x1be   : > { %s763_s12 = sld [smem:[%s5210_s17 + %s5212_s8]]  ;;  %s760_s10 = scalar_lea.sflag [#allocation9], %s759_s13 }
 0x1bf   : > { %s5160_s0 = sld [smem:[#allocation57_spill]]  ;;  %p3895_p8 = pneg %p4674_p2 }
 0x1c4   : > { %s2318_s25 = sshll.u32 %s763_s12, 4 }
 0x1c5   : > { %s4692_s24 = scalar_lea.hbm %s5160_s0, %s2318_s25  ;;  %s3898_s17 = scalar_lea.hbm %s5160_s0, 128 }
 0x1c6   : > { %s3893_s18 = scalar_lea.hbm %s4692_s24, 16  ;;  %p3899_p11 = scmp.lt.u32.totalorder %s4692_s24, %s5160_s0 }
 0x1c7   : > { %p3894_p7 = scmp.ne.s32.totalorder %s4692_s24, %s3893_s18  ;;  %p3900_p12 = scmp.lt.u32.totalorder %s3898_s17, %s3893_s18 }
 0x1c8   : > { %p3902_p4 = scmp.lt.u32.totalorder %s3893_s18, %s4692_s24 }
 0x1c9   : > { %p3896_p9 = pnand %p3895_p8, %p3894_p7  ;;  %p3901_p0 = por %p3900_p12, %p3899_p11 }
 0x1cb   : > { %p3897_p6 = pneg %p3896_p9  ;;  %p3903_p1 = por %p3902_p4, %p3901_p0 }
 0x1cd   : > { %p3904_p10 = pnand %p3903_p1, %p3897_p6 }
 0x1cf   : > { %3907 = shalt.err (!%p3904_p10)
}
 0x1d0   : > { %s3908_s13 = scalar_lea.vmem %s4687_s23, 16  ;;  %s4090_s2 = smov [#allocation8]  }
 0x1d1   : > { %p3909_p5 = scmp.ne.s32.totalorder %s4687_s23, %s3908_s13  ;;  %s3913_s25 = sshll.u32 %s4090_s2, 4  ;;  %s3914_s25 = int_to_ptr.vmem [resolvable:$false] %s3913_s25 }
 0x1d2   : > { %s3915_s7 = scalar_lea.vmem %s3914_s25, 32  ;;  %p3916_p3 = scmp.lt.s32.totalorder %s4687_s23, %s3914_s25 }
 0x1d3   : > { %p3911_p7 = pnand %p3909_p5, %p3895_p8  ;;  %p3917_p11 = scmp.lt.s32.totalorder %s3915_s7, %s3908_s13 }
 0x1d5   : > { %p3912_p9 = pneg %p3911_p7  ;;  %p3918_p12 = por %p3917_p11, %p3916_p3 }
 0x1d7   : > { %p3919_p0 = pnand %p3918_p12, %p3912_p9 }
 0x1d9   : > { %3922 = shalt.err (!%p3919_p0)
}
 0x1da   : > { %3357 = dma.hbm_to_vmem [thread:$0]  (!%p4674_p2), %s4692_s24, 16, %s4687_s23, %s760_s10  }
 0x1db   : > { %s5161_s22 = sld [smem:[#allocation52_spill]] }
 0x1e1   : > { %p5162_p6 = scmp.ne.s32.totalorder %s5161_s22, 0 }
 0x1e2   : > { %s817_s18 = sand.u32 (!%p5162_p6), 1, %s4063_s4  }
 0x1e3   : > { %815 = sbr.rel (%p5162_p6) target bundleno = 1806 (0x70e), region = 100  ;;  %s818_s27 = scalar_lea.sflag (!%p5162_p6), [#allocation6], %s817_s18 }
 0x1e4   : > { %s4722_s15 = scalar_lea.vmem (!%p5162_p6), [#allocation5], %s817_s18 }
 0x1ea   : > { %3994 = dma.done.wait (%p4570_p13), %s818_s27, 16  }
 0x1eb   : > { %3996 = vsyncadd (%p4570_p13), %s818_s27, 4294967280  ;;  %s5163_s17 = sld [smem:[#allocation51_spill]]  ;;  %s5164_s8 = sld [smem:[#allocation48_spill]] }
 0x1ec   : > { %p5165_p3 = scmp.ne.s32.totalorder %s5153_s9, 0 }
 0x1f1   : > { %s825_s14 = sand.u32 1, %s5163_s17   ;;  %s827_s12 = sand.u32 1, %s5164_s8  }
 0x1f2   : > { %s826_s23 = scalar_lea.sflag [#allocation9], %s825_s14  ;;  %s4730_s24 = scalar_lea.vmem [#allocation8], %s827_s12 }
 0x1f3   : > { %3998 = dma.done.wait (%p5165_p3), %s826_s23, 16  }
 0x1f4   : > { %4000 = vsyncadd (%p5165_p3), %s826_s23, 4294967280  ;;  %p5166_p2 = scmp.eq.s32.totalorder %s5163_s17, 0 }
 0x1f6   : > { %4002 = dma.done.wait (%p5166_p2), [#allocation9], 4096   ;;  %p5167_p8 = pmov %p5166_p2 }
 0x1f7   : > { %p5168_p13 = pmov %p5166_p2 }
 0x1f8   : > { %4004 = vsyncadd (%p5167_p8), [#allocation9], 4294963200 }
 0x1f9   : > { %4006 = dma.done.wait (%p5168_p13), [#allocation12], 2064   ;;  %p5169_p4 = pmov %p5166_p2 }
 0x1fa   : > { %p5170_p1 = pmov %p5166_p2 }
 0x1fb   : > { %4008 = vsyncadd (%p5169_p4), [#allocation12], 4294965232 }
 0x1fc   : > { %4010 = dma.done.wait (%p5170_p1), [#allocation15], 4112   ;;  %p5171_p10 = pmov %p5170_p1 }
 0x1fd   : > { %p5172_p5 = pmov %p5170_p1 }
 0x1fe   : > { %4012 = vsyncadd (%p5171_p10), [#allocation15], 4294963184 }
 0x1ff   : > { %4014 = dma.done.wait (%p5172_p5), [#allocation18], 2064   ;;  %p5173_p7 = pmov %p5170_p1 }
 0x200   : > { %p5174_p9 = pmov %p5170_p1 }
 0x201   : > { %4016 = vsyncadd (%p5173_p7), [#allocation18], 4294965232 }
 0x202   : > { %4018 = dma.done.wait (%p5174_p9), [#allocation21], 4112   ;;  %p5175_p11 = pmov %p5170_p1 }
 0x203   : > { %p5176_p12 = pmov %p5170_p1 }
 0x204   : > { %4020 = vsyncadd (%p5175_p11), [#allocation21], 4294963184 }
 0x205   : > { %4022 = dma.done.wait (%p5176_p12), [#allocation24], 2064   ;;  %p5177_p0 = pmov %p5170_p1 }
 0x207   : > { %4024 = vsyncadd (%p5177_p0), [#allocation24], 4294965232  ;;  %p5178_p6 = pmov %p5177_p0 }
 0x208   : > { %p5179_p3 = pmov %p5177_p0 }
 0x209   : > { %4026 = dma.done.wait (%p5178_p6), [#allocation27], 16  }
 0x20a   : > { %4028 = vsyncadd (%p5179_p3), [#allocation27], 4294967280  ;;  %v4091_v0 = vmov 0.0|0.0   ;;  %vm4092_vm0 = vmmov 0   ;;  %v4093_v1 = vmov 0.0   ;;  %v1017_v2 = vld [vmem:[#allocation10 + $0x80] sm:$0xff] }
 0x20b   : > { %2964 = vmatprep.subr.bf16.mxu0 %v4091_v0  ;;  %2988 = vmatprep.subr.bf16.mxu1 %v4091_v0  ;;  %v1018_v3 = vld [vmem:[#allocation10 + $0x88] sm:$0xff]  ;;  %v1000_v4 = vld [vmem:[#allocation10] sm:$0xff]  ;;  %v1019_v7 = vld [vmem:[#allocation10 + $0x90] sm:$0xff]  ;;  %s4777_s1 = sld [smem:[#allocation3 + %s5163_s17]]  ;;  %vm2017_vm1 = vcmask 1040384   ;;  %p5188_p7 = scmp.ne.s32.totalorder %s5144_s5, 0 }
 0x20c   : > { %2576 = vmatprep.mubr.msk.f32.mxu0 %vm4092_vm0, %v4093_v1  ;;  %2611 = vmatprep.mubr.msk.f32.mxu1 %vm4092_vm0, %v4093_v1  ;;  %v2965_v5 = vpack.c.bf16 %v1018_v3, %v1017_v2  ;;  %v1001_v6 = vld [vmem:[#allocation10 + $0x8] sm:$0xff]  ;;  %v1020_v8 = vld [vmem:[#allocation10 + $0x98] sm:$0xff]  ;;  %v1002_v10 = vld [vmem:[#allocation10 + $0x10] sm:$0xff]  ;;  %s5180_s13 = sld [smem:[#allocation54_spill]]  ;;  %s5181_s18 = sld [smem:[#allocation56_spill]] }
 0x20d   : > { %v2989_v9 = vpack.c.bf16 %v1001_v6, %v1000_v4  ;;  %v1003_v11 = vld [vmem:[#allocation10 + $0x18] sm:$0xff]  ;;  %v2968_v12 = vpack.c.bf16 %v1020_v8, %v1019_v7  ;;  %v1021_v14 = vld [vmem:[#allocation10 + $0xa0] sm:$0xff]  ;;  %v1022_v15 = vld [vmem:[#allocation10 + $0xa8] sm:$0xff]  ;;  %s968_s25 = sld [smem:[#allocation4 + %s5163_s17]] }
 0x20e   : > { %2966 = vmatpush3.bf16.msra.mxu0 %v2965_v5  ;;  %v2992_v13 = vpack.c.bf16 %v1003_v11, %v1002_v10  ;;  %v1004_v16 = vld [vmem:[#allocation10 + $0x20] sm:$0xff]  ;;  %v1005_v17 = vld [vmem:[#allocation10 + $0x28] sm:$0xff]  ;;  %v2971_v18 = vpack.c.bf16 %v1022_v15, %v1021_v14  ;;  %v1023_v20 = vld [vmem:[#allocation10 + $0xb0] sm:$0xff]  ;;  %s5182_s12 = sld [smem:[#allocation59_spill]]  ;;  %s5183_s10 = sld [smem:[#allocation58_spill]] }
 0x20f   : > { %2990 = vmatpush3.bf16.msra.mxu1 %v2989_v9  ;;  %2967 = vmatprep.subr.bf16.mxu0 %v4091_v0  ;;  %v2995_v19 = vpack.c.bf16 %v1005_v17, %v1004_v16  ;;  %v1024_v21 = vld [vmem:[#allocation10 + $0xb8] sm:$0xff]  ;;  %v1006_v22 = vld [vmem:[#allocation10 + $0x30] sm:$0xff]  ;;  %v1025_v26 = vld [vmem:[#allocation10 + $0xc0] sm:$0xff] }
 0x210   : > { %2991 = vmatprep.subr.bf16.mxu1 %v4091_v0  ;;  %v1007_v23 = vld [vmem:[#allocation10 + $0x38] sm:$0xff]  ;;  %v2974_v24 = vpack.c.bf16 %v1024_v21, %v1023_v20  ;;  %v1026_v27 = vld [vmem:[#allocation10 + $0xc8] sm:$0xff]  ;;  %v1008_v28 = vld [vmem:[#allocation10 + $0x40] sm:$0xff] }
 0x211   : > { %v2998_v25 = vpack.c.bf16 %v1007_v23, %v1006_v22  ;;  %v1009_v29 = vld [vmem:[#allocation10 + $0x48] sm:$0xff]  ;;  %v2977_v30 = vpack.c.bf16 %v1026_v27, %v1025_v26  ;;  %v1027_v32 = vld [vmem:[#allocation10 + $0xd0] sm:$0xff]  ;;  %v1028_v33 = vld [vmem:[#allocation10 + $0xd8] sm:$0xff]  ;;  %p963_p2 = scmp.lt.s32.totalorder %s4777_s1, 15 }
 0x212   : > { %2969 = vmatpush3.bf16.msra.mxu0 %v2968_v12  ;;  %v3001_v31 = vpack.c.bf16 %v1009_v29, %v1008_v28  ;;  %v1010_v34 = vld [vmem:[#allocation10 + $0x50] sm:$0xff]  ;;  %v1011_v35 = vld [vmem:[#allocation10 + $0x58] sm:$0xff]  ;;  %v2980_v36 = vpack.c.bf16 %v1028_v33, %v1027_v32  ;;  %v1029_v38 = vld [vmem:[#allocation10 + $0xe0] sm:$0xff] }
 0x213   : > { %2993 = vmatpush3.bf16.msra.mxu1 %v2992_v13  ;;  %2970 = vmatprep.subr.bf16.mxu0 %v4091_v0  ;;  %v3004_v37 = vpack.c.bf16 %v1011_v35, %v1010_v34  ;;  %v1030_v39 = vld [vmem:[#allocation10 + $0xe8] sm:$0xff]  ;;  %v1012_v40 = vld [vmem:[#allocation10 + $0x60] sm:$0xff]  ;;  %v1031_v44 = vld [vmem:[#allocation10 + $0xf0] sm:$0xff]  ;;  %s5214_s1 = smov (!%p963_p2, %s4777_s1), 15  ;;  %p969_p8 = scmp.lt.s32.totalorder %s968_s25, 7 }
 0x214   : > { %2994 = vmatprep.subr.bf16.mxu1 %v4091_v0  ;;  %v1013_v41 = vld [vmem:[#allocation10 + $0x68] sm:$0xff]  ;;  %v2983_v42 = vpack.c.bf16 %v1030_v39, %v1029_v38  ;;  %v1032_v45 = vld [vmem:[#allocation10 + $0xf8] sm:$0xff]  ;;  %v1014_v46 = vld [vmem:[#allocation10 + $0x70] sm:$0xff]  ;;  %s965_s2 = scalar_lea.vmem %s5180_s13, %s5214_s1  ;;  %s5186_s1 = sld [smem:[#allocation45_spill]] }
 0x215   : > { %v3007_v43 = vpack.c.bf16 %v1013_v41, %v1012_v40  ;;  %v1015_v47 = vld [vmem:[#allocation10 + $0x78] sm:$0xff]  ;;  %v2986_v48 = vpack.c.bf16 %v1032_v45, %v1031_v44  ;;  %v1176_v50 = vld [vmem:[#allocation13] sm:$0xff]  ;;  %v1177_v51 = vld [vmem:[#allocation13 + $0x8] sm:$0xff]  ;;  %s5216_s25 = smov (!%p969_p8, %s968_s25), 7 }
 0x216   : > { %2972 = vmatpush3.bf16.msra.mxu0 %v2971_v18  ;;  %v3010_v49 = vpack.c.bf16 %v1015_v47, %v1014_v46  ;;  %v999_v52 = vld [vmem:[%s4722_s15] sm:$0x1]  ;;  %v3013_v53 = vpack.c.bf16 %v1177_v51, %v1176_v50  ;;  %v1178_v55 = vld [vmem:[#allocation13 + $0x10] sm:$0xff]  ;;  %v1180_v58 = vld [vmem:[#allocation13 + $0x20] sm:$0xff]  ;;  %s971_s27 = scalar_lea.vmem %s5181_s18, %s5216_s25  ;;  %s979_s15 = sld [smem:[#allocation3 + %s5163_s17]] }
 0x217   : > { %2996 = vmatpush3.bf16.msra.mxu1 %v2995_v19  ;;  %2973 = vmatprep.subr.bf16.mxu0 %v4091_v0  ;;  %v998_v54 = vld [vmem:[%s965_s2] sm:$0x1]  ;;  %v1181_v59 = vld [vmem:[#allocation13 + $0x28] sm:$0xff]  ;;  %v1182_v61 = vld [vmem:[#allocation13 + $0x30] sm:$0xff]  ;;  %s991_s2 = sld [smem:[#allocation4 + %s5163_s17]] }
 0x218   : > { %2997 = vmatprep.subr.bf16.mxu1 %v4091_v0  ;;  %v1179_v56 = vld [vmem:[#allocation13 + $0x18] sm:$0xff]  ;;  %v3019_v60 = vpack.c.bf16 %v1181_v59, %v1180_v58  ;;  %v1184_v2 = vld [vmem:[#allocation13 + $0x40] sm:$0xff]  ;;  %v1185_v3 = vld [vmem:[#allocation13 + $0x48] sm:$0xff]  ;;  %s5184_s18 = sld [smem:[#allocation61_spill]] }
 0x219   : > { %v3016_v57 = vpack.c.bf16 %v1179_v56, %v1178_v55  ;;  %v1183_v62 = vld [vmem:[#allocation13 + $0x38] sm:$0xff]  ;;  %v3025_v4 = vpack.c.bf16 %v1185_v3, %v1184_v2  ;;  %v1186_v5 = vld [vmem:[#allocation13 + $0x50] sm:$0xff]  ;;  %v1188_v8 = vld [vmem:[#allocation13 + $0x60] sm:$0xff] }
 0x21a   : > { %2975 = vmatpush3.bf16.msra.mxu0 %v2974_v24  ;;  %v3022_v63 = vpack.c.bf16 %v1183_v62, %v1182_v61  ;;  %v1187_v6 = vld [vmem:[#allocation13 + $0x58] sm:$0xff]  ;;  %v1189_v9 = vld [vmem:[#allocation13 + $0x68] sm:$0xff]  ;;  %v1190_v10 = vld [vmem:[#allocation13 + $0x70] sm:$0xff]  ;;  %s959_s9 = sand.u32 1, %s5186_s1  }
 0x21b   : > { %2999 = vmatpush3.bf16.msra.mxu1 %v2998_v25  ;;  %2976 = vmatprep.subr.bf16.mxu0 %v4091_v0  ;;  %v3028_v7 = vpack.c.bf16 %v1187_v6, %v1186_v5  ;;  %v3031_v11 = vpack.c.bf16 %v1189_v9, %v1188_v8  ;;  %v1191_v12 = vld [vmem:[#allocation13 + $0x78] sm:$0xff]  ;;  %v1283_v13 = vld [vmem:[#allocation16 + $0x80] sm:$0xff]  ;;  %v1284_v14 = vld [vmem:[#allocation16 + $0x88] sm:$0xff] }
 0x21c   : > { %3000 = vmatprep.subr.bf16.mxu1 %v4091_v0  ;;  %v3037_v15 = vpack.c.bf16 %v1284_v14, %v1283_v13  ;;  %v3034_v16 = vpack.c.bf16 %v1191_v12, %v1190_v10  ;;  %v1285_v17 = vld [vmem:[#allocation16 + $0x90] sm:$0xff]  ;;  %v1286_v18 = vld [vmem:[#allocation16 + $0x98] sm:$0xff]  ;;  %v1287_v20 = vld [vmem:[#allocation16 + $0xa0] sm:$0xff]  ;;  %p980_p13 = scmp.lt.s32.totalorder %s979_s15, 23 }
 0x21d   : > { %v3040_v19 = vpack.c.bf16 %v1286_v18, %v1285_v17  ;;  %v1288_v21 = vld [vmem:[#allocation16 + $0xa8] sm:$0xff]  ;;  %v1289_v23 = vld [vmem:[#allocation16 + $0xb0] sm:$0xff]  ;;  %v1290_v24 = vld [vmem:[#allocation16 + $0xb8] sm:$0xff]  ;;  %s992_s25 = sadd.s32 16, %s991_s2 }
 0x21e   : > { %2978 = vmatpush3.bf16.msra.mxu0 %v2977_v30  ;;  %v3043_v22 = vpack.c.bf16 %v1288_v21, %v1287_v20  ;;  %v3046_v25 = vpack.c.bf16 %v1290_v24, %v1289_v23  ;;  %v1291_v26 = vld [vmem:[#allocation16 + $0xc0] sm:$0xff]  ;;  %v1292_v27 = vld [vmem:[#allocation16 + $0xc8] sm:$0xff]  ;;  %v1293_v29 = vld [vmem:[#allocation16 + $0xd0] sm:$0xff]  ;;  %s5218_s15 = smov (!%p980_p13, %s979_s15), 23  ;;  %p993_p1 = scmp.lt.s32.totalorder %s992_s25, 23 }
 0x21f   : > { %3002 = vmatpush3.bf16.msra.mxu1 %v3001_v31  ;;  %2979 = vmatprep.subr.bf16.mxu0 %v4091_v0  ;;  %v3049_v28 = vpack.c.bf16 %v1292_v27, %v1291_v26  ;;  %v1294_v30 = vld [vmem:[#allocation16 + $0xd8] sm:$0xff]  ;;  %v1295_v32 = vld [vmem:[#allocation16 + $0xe0] sm:$0xff]  ;;  %v1296_v33 = vld [vmem:[#allocation16 + $0xe8] sm:$0xff]  ;;  %s982_s23 = scalar_lea.vmem %s5182_s12, %s5218_s15  ;;  %s984_s15 = sld [smem:[#allocation4 + %s5163_s17]] }
 0x220   : > { %3003 = vmatprep.subr.bf16.mxu1 %v4091_v0  ;;  %v3052_v31 = vpack.c.bf16 %v1294_v30, %v1293_v29  ;;  %v3055_v34 = vpack.c.bf16 %v1296_v33, %v1295_v32  ;;  %v1297_v35 = vld [vmem:[#allocation16 + $0xf0] sm:$0xff]  ;;  %v1265_v38 = vld [vmem:[%s4730_s24] sm:$0x1]  ;;  %v1173_v41 = vld [vmem:[#allocation11] sm:$0x1]  ;;  %s974_s24 = sld [smem:[#allocation3 + %s5163_s17]] }
 0x221   : > { %v1266_v46 = vld [vmem:[#allocation16] sm:$0xff]  ;;  %v1267_v47 = vld [vmem:[#allocation16 + $0x8] sm:$0xff]  ;;  %v1269_v50 = vld [vmem:[#allocation16 + $0x18] sm:$0xff]  ;;  %s5222_s25 = smov (!%p993_p1, %s992_s25), 23 }
 0x222   : > { %2981 = vmatpush3.bf16.msra.mxu0 %v2980_v36  ;;  %v1298_v36 = vld [vmem:[#allocation16 + $0xf8] sm:$0xff]  ;;  %v1272_v56 = vld [vmem:[#allocation16 + $0x30] sm:$0xff]  ;;  %v1274_v59 = vld [vmem:[#allocation16 + $0x40] sm:$0xff] }
 0x223   : > { %3005 = vmatpush3.bf16.msra.mxu1 %v3004_v37  ;;  %2982 = vmatprep.subr.bf16.mxu0 %v4091_v0  ;;  %v3058_v37 = vpack.c.bf16 %v1298_v36, %v1297_v35  ;;  %v1276_v62 = vld [vmem:[#allocation16 + $0x50] sm:$0xff]  ;;  %v1278_v3 = vld [vmem:[#allocation16 + $0x60] sm:$0xff]  ;;  %v1264_v9 = vld [vmem:[%s971_s27] sm:$0x1]  ;;  %s995_s27 = scalar_lea.vmem %s5184_s18, %s5222_s25  ;;  %s5187_s18 = sld [smem:[#allocation71_spill]] }
 0x224   : > { %3006 = vmatprep.subr.bf16.mxu1 %v4091_v0  ;;  %v1280_v6 = vld [vmem:[#allocation16 + $0x70] sm:$0xff]  ;;  %v1442_v10 = vld [vmem:[#allocation19] sm:$0xff]  ;;  %v1445_v14 = vld [vmem:[#allocation19 + $0x18] sm:$0xff] }
 0x225   : > { %v1444_v12 = vld [vmem:[#allocation19 + $0x10] sm:$0xff]  ;;  %v1447_v17 = vld [vmem:[#allocation19 + $0x28] sm:$0xff]  ;;  %v1449_v20 = vld [vmem:[#allocation19 + $0x38] sm:$0xff]  ;;  %s985_s8 = sadd.s32 16, %s984_s15  ;;  %s2033_s15 = scalar_lea.sflag [#allocation7], %s959_s9 }
 0x226   : > { %2984 = vmatpush3.bf16.msra.mxu0 %v2983_v42  ;;  %v1451_v23 = vld [vmem:[#allocation19 + $0x48] sm:$0xff]  ;;  %v1452_v27 = vld [vmem:[#allocation19 + $0x50] sm:$0xff]  ;;  %v1454_v30 = vld [vmem:[#allocation19 + $0x60] sm:$0xff]  ;;  %p975_p4 = scmp.lt.s32.totalorder %s974_s24, 23  ;;  %p986_p10 = scmp.lt.s32.totalorder %s985_s8, 23 }
 0x227   : > { %3008 = vmatpush3.bf16.msra.mxu1 %v3007_v43  ;;  %2985 = vmatprep.subr.bf16.mxu0 %v4091_v0  ;;  %v1456_v32 = vld [vmem:[#allocation19 + $0x70] sm:$0xff]  ;;  %v1549_v35 = vld [vmem:[#allocation22 + $0x80] sm:$0xff] }
 0x228   : > { %3009 = vmatprep.subr.bf16.mxu1 %v4091_v0  ;;  %v1550_v36 = vld [vmem:[#allocation22 + $0x88] sm:$0xff]  ;;  %s5220_s24 = smov (!%p975_p4, %s974_s24), 23  ;;  %s5224_s8 = smov (!%p986_p10, %s985_s8), 23 }
 0x229   : > { %s977_s13 = scalar_lea.vmem %s5183_s10, %s5220_s24  ;;  %s2332_s10 = sshll.u32 %s959_s9, 2 }
 0x22a   : > { %2987 = vmatpush3.bf16.msra.mxu0 %v2986_v48  ;;  %v3061_v48 = vpack.c.bf16 %v1267_v47, %v1266_v46  ;;  %v1556_v46 = vld [vmem:[#allocation22 + $0xb8] sm:$0xff]  ;;  %s961_s2 = scalar_lea.vmem [#allocation28], %s2332_s10 }
 0x22b   : > { %3011 = vmatpush3.bf16.msra.mxu1 %v3010_v49  ;;  %3012 = vmatprep.subr.bf16.mxu0 %v4091_v0  ;;  %v1268_v49 = vld [vmem:[#allocation16 + $0x10] sm:$0xff]  ;;  %s2047_s25 = sshll.u32 %s961_s2, 4  ;;  %s4993_s25 = int_to_ptr.vmem [resolvable:$true] %s2047_s25 }
 0x22c   : > { %3036 = vmatprep.subr.bf16.mxu1 %v4091_v0 }
 0x22d   : > { %2577 = vmatmul.mubr.f32.vlgmr.msra.gmra.mrb[0].mxu0 %v999_v52  ;;  %v3064_v52 = vpack.c.bf16 %v1269_v50, %v1268_v49  ;;  %v1558_v49 = vld [vmem:[#allocation22 + $0xc8] sm:$0xff] }
 0x22e   : > { %2612 = vmatmul.mubr.f32.vlgmr.msra.gmra.mrb[0].mxu1 %v998_v54  ;;  %3014 = vmatpush3.bf16.msra.mxu0 %v3013_v53  ;;  %v1270_v53 = vld [vmem:[#allocation16 + $0x20] sm:$0xff]  ;;  %v1271_v54 = vld [vmem:[#allocation16 + $0x28] sm:$0xff] }
 0x22f   : > { %3015 = vmatprep.subr.bf16.mxu0 %v4091_v0  ;;  %2646 = vmatprep.mubr.msk.f32.mxu0 %vm4092_vm0, %v4093_v1  ;;  %v3067_v55 = vpack.c.bf16 %v1271_v54, %v1270_v53  ;;  %v1561_v54 = vld [vmem:[#allocation22 + $0xe0] sm:$0xff] }
 0x230   : > { %2681 = vmatprep.mubr.msk.f32.mxu1 %vm4092_vm0, %v4093_v1  ;;  %3038 = vmatpush3.bf16.msra.mxu1 %v3037_v15  ;;  %v3088_v15 = vpack.c.bf16 %v1445_v14, %v1444_v12  ;;  %v1537_v14 = vld [vmem:[#allocation22 + $0x28] sm:$0xff] }
 0x231   : > { %3039 = vmatprep.subr.bf16.mxu1 %v4091_v0 }
 0x232   : > { %3017 = vmatpush3.bf16.msra.mxu0 %v3016_v57  ;;  %v1273_v57 = vld [vmem:[#allocation16 + $0x38] sm:$0xff] }
 0x233   : > { %3018 = vmatprep.subr.bf16.mxu0 %v4091_v0  ;;  %v3070_v58 = vpack.c.bf16 %v1273_v57, %v1272_v56  ;;  %v1563_v57 = vld [vmem:[#allocation22 + $0xf0] sm:$0xff] }
 0x234   : > { %3041 = vmatpush3.bf16.msra.mxu1 %v3040_v19  ;;  %v1448_v19 = vld [vmem:[#allocation19 + $0x30] sm:$0xff] }
 0x235   : > { %3042 = vmatprep.subr.bf16.mxu1 %v4091_v0  ;;  %v3094_v21 = vpack.c.bf16 %v1449_v20, %v1448_v19  ;;  %v1540_v19 = vld [vmem:[#allocation22 + $0x40] sm:$0xff]  ;;  %v1541_v20 = vld [vmem:[#allocation22 + $0x48] sm:$0xff] }
 0x236   : > { %3020 = vmatpush3.bf16.msra.mxu0 %v3019_v60  ;;  %v1275_v60 = vld [vmem:[#allocation16 + $0x48] sm:$0xff] }
 0x237   : > { %3021 = vmatprep.subr.bf16.mxu0 %v4091_v0  ;;  %v3073_v61 = vpack.c.bf16 %v1275_v60, %v1274_v59  ;;  %v1531_v60 = vld [vmem:[%s982_s23] sm:$0x1]  ;;  %s5185_s23 = sld [smem:[#allocation60_spill]] }
 0x238   : > { %3044 = vmatpush3.bf16.msra.mxu1 %v3043_v22  ;;  %v1450_v22 = vld [vmem:[#allocation19 + $0x40] sm:$0xff] }
 0x239   : > { %3045 = vmatprep.subr.bf16.mxu1 %v4091_v0  ;;  %v3097_v24 = vpack.c.bf16 %v1451_v23, %v1450_v22  ;;  %v1542_v22 = vld [vmem:[#allocation22 + $0x50] sm:$0xff]  ;;  %v1543_v23 = vld [vmem:[#allocation22 + $0x58] sm:$0xff] }
 0x23a   : > { %3023 = vmatpush3.bf16.msra.mxu0 %v3022_v63  ;;  %v1277_v63 = vld [vmem:[#allocation16 + $0x58] sm:$0xff] }
 0x23b   : > { %3024 = vmatprep.subr.bf16.mxu0 %v4091_v0  ;;  %v3076_v2 = vpack.c.bf16 %v1277_v63, %v1276_v62 }
 0x23c   : > { %3047 = vmatpush3.bf16.msra.mxu1 %v3046_v25 }
 0x23d   : > { %3048 = vmatprep.subr.bf16.mxu1 %v4091_v0  ;;  %s988_s24 = scalar_lea.vmem %s5185_s23, %s5224_s8  ;;  %s3923_s8 = scalar_lea.vmem %s4993_s25, 64 }
 0x23e   : > { %3026 = vmatpush3.bf16.msra.mxu0 %v3025_v4  ;;  %v1279_v4 = vld [vmem:[#allocation16 + $0x68] sm:$0xff]  ;;  %p3924_p5 = scmp.ne.s32.totalorder %s4993_s25, %s3923_s8 }
 0x23f   : > { %3027 = vmatprep.subr.bf16.mxu0 %v4091_v0  ;;  %v3079_v5 = vpack.c.bf16 %v1279_v4, %v1278_v3 }
 0x240   : > { %3050 = vmatpush3.bf16.msra.mxu1 %v3049_v28  ;;  %v1453_v28 = vld [vmem:[#allocation19 + $0x58] sm:$0xff]  ;;  %p3925_p9 = pnand %p3924_p5, %p5188_p7 }
 0x241   : > { %3051 = vmatprep.subr.bf16.mxu1 %v4091_v0  ;;  %v3100_v29 = vpack.c.bf16 %v1453_v28, %v1452_v27  ;;  %v1546_v28 = vld [vmem:[#allocation22 + $0x70] sm:$0xff] }
 0x242   : > { %3029 = vmatpush3.bf16.msra.mxu0 %v3028_v7  ;;  %v1281_v7 = vld [vmem:[#allocation16 + $0x78] sm:$0xff]  ;;  %p3926_p11 = pneg %p3925_p9 }
 0x243   : > { %3030 = vmatprep.subr.bf16.mxu0 %v4091_v0  ;;  %v3082_v8 = vpack.c.bf16 %v1281_v7, %v1280_v6  ;;  %v1532_v6 = vld [vmem:[#allocation22] sm:$0xff]  ;;  %v1533_v7 = vld [vmem:[#allocation22 + $0x8] sm:$0xff] }
 0x244   : > { %3053 = vmatpush3.bf16.msra.mxu1 %v3052_v31  ;;  %v1455_v31 = vld [vmem:[#allocation19 + $0x68] sm:$0xff] }
 0x245   : > { %3054 = vmatprep.subr.bf16.mxu1 %v4091_v0  ;;  %v3103_v33 = vpack.c.bf16 %v1455_v31, %v1454_v30  ;;  %v1530_v31 = vld [vmem:[%s977_s13] sm:$0x1]  ;;  %s2339_s13 = sshll.u32 %s5163_s17, 6  ;;  %s4094_s17 = smov [#allocation28]  }
 0x246   : > { %3032 = vmatpush3.bf16.msra.mxu0 %v3031_v11  ;;  %v1443_v11 = vld [vmem:[#allocation19 + $0x8] sm:$0xff]  ;;  %s3927_s14 = sshll.u32 %s4094_s17, 4  ;;  %s3928_s14 = int_to_ptr.vmem [resolvable:$false] %s3927_s14 }
 0x247   : > { %3033 = vmatprep.subr.bf16.mxu0 %v4091_v0  ;;  %v3085_v13 = vpack.c.bf16 %v1443_v11, %v1442_v10  ;;  %v1535_v10 = vld [vmem:[#allocation22 + $0x18] sm:$0xff]  ;;  %s3929_s12 = scalar_lea.vmem %s3928_s14, 128  ;;  %p3930_p12 = scmp.lt.s32.totalorder %s4993_s25, %s3928_s14 }
 0x248   : > { %3056 = vmatpush3.bf16.msra.mxu1 %v3055_v34  ;;  %v1457_v34 = vld [vmem:[#allocation19 + $0x78] sm:$0xff]  ;;  %p3931_p0 = scmp.lt.s32.totalorder %s3929_s12, %s3923_s8 }
 0x249   : > { %3057 = vmatprep.subr.bf16.mxu1 %v4091_v0 }
 0x24a   : > { %3035 = vmatpush3.bf16.msra.mxu0 %v3034_v16  ;;  %v1446_v16 = vld [vmem:[#allocation19 + $0x20] sm:$0xff]  ;;  %p3932_p6 = por %p3931_p0, %p3930_p12 }
 0x24b   : > { %3060 = vmatprep.subr.bf16.mxu0 %v4091_v0  ;;  %v3091_v18 = vpack.c.bf16 %v1447_v17, %v1446_v16  ;;  %v1538_v16 = vld [vmem:[#allocation22 + $0x30] sm:$0xff]  ;;  %v1539_v17 = vld [vmem:[#allocation22 + $0x38] sm:$0xff] }
 0x24c   : > { %3059 = vmatpush3.bf16.msra.mxu1 %v3058_v37  ;;  %v4842_v37 = vpack.c.bf16 %v1550_v36, %v1549_v35  ;;  %v1710_v35 = vld [vmem:[#allocation25 + $0x10] sm:$0xff]  ;;  %v1711_v36 = vld [vmem:[#allocation25 + $0x18] sm:$0xff]  ;;  %p3933_p3 = pnand %p3932_p6, %p3926_p11 }
 0x24d   : > { %3084 = vmatprep.subr.bf16.mxu1 %v4091_v0 }
 0x24f   : > { %2682 = vmatmul.mubr.f32.vlgmr.msra.gmra.mrb[2].mxu1 %v1265_v38  ;;  %v3106_v38 = vpack.c.bf16 %v1457_v34, %v1456_v32  ;;  %v1708_v32 = vld [vmem:[#allocation25] sm:$0xff] }
 0x250   : > { %2751 = vmatprep.mubr.msk.f32.mxu1 %vm4092_vm0, %v4093_v1  ;;  %3086 = vmatpush3.bf16.msra.mxu1 %v3085_v13  ;;  %v1536_v13 = vld [vmem:[#allocation22 + $0x20] sm:$0xff] }
 0x251   : > { %3087 = vmatprep.subr.bf16.mxu1 %v4091_v0 }
 0x254   : > { %3089 = vmatpush3.bf16.msra.mxu1 %v3088_v15  ;;  %v4894_v15 = vpack.c.bf16 %v1537_v14, %v1536_v13 }
 0x255   : > { %3090 = vmatprep.subr.bf16.mxu1 %v4091_v0 }
 0x258   : > { %3092 = vmatpush3.bf16.msra.mxu1 %v3091_v18  ;;  %v4898_v18 = vpack.c.bf16 %v1539_v17, %v1538_v16 }
 0x259   : > { %3093 = vmatprep.subr.bf16.mxu1 %v4091_v0 }
 0x25c   : > { %3095 = vmatpush3.bf16.msra.mxu1 %v3094_v21  ;;  %v4903_v21 = vpack.c.bf16 %v1541_v20, %v1540_v19 }
 0x25d   : > { %3096 = vmatprep.subr.bf16.mxu1 %v4091_v0 }
 0x260   : > { %3098 = vmatpush3.bf16.msra.mxu1 %v3097_v24  ;;  %v4907_v24 = vpack.c.bf16 %v1543_v23, %v1542_v22 }
 0x261   : > { %3099 = vmatprep.subr.bf16.mxu1 %v4091_v0 }
 0x264   : > { %3101 = vmatpush3.bf16.msra.mxu1 %v3100_v29  ;;  %v1547_v29 = vld [vmem:[#allocation22 + $0x78] sm:$0xff] }
 0x265   : > { %3102 = vmatprep.subr.bf16.mxu1 %v4091_v0  ;;  %v4915_v30 = vpack.c.bf16 %v1547_v29, %v1546_v28 }
 0x268   : > { %3104 = vmatpush3.bf16.msra.mxu1 %v3103_v33  ;;  %v1709_v33 = vld [vmem:[#allocation25 + $0x8] sm:$0xff] }
 0x269   : > { %3105 = vmatprep.subr.bf16.mxu1 %v4091_v0  ;;  %v3157_v34 = vpack.c.bf16 %v1709_v33, %v1708_v32 }
 0x26c   : > { %3107 = vmatpush3.bf16.msra.mxu1 %v3106_v38  ;;  %v1712_v38 = vld [vmem:[#allocation25 + $0x20] sm:$0xff] }
 0x26d   : > { %3132 = vmatprep.subr.bf16.mxu1 %v4091_v0 }
 0x300   : > { %v1099_v39 = vpop.f32.mrb[0].mxu0 }
 0x301   : > { %v1169_v40 = vpop.f32.mrb[0].mxu1  ;;  %v2578_v42 = vpop.f32.mrb[1].mxu0 }
 0x302   : > { %v1170_v43 = vadd.f32 %v1169_v40, %v1099_v39  ;;  %v2613_v44 = vpop.f32.mrb[1].mxu1  ;;  %v1551_v39 = vld [vmem:[#allocation22 + $0x90] sm:$0xff]  ;;  %v1552_v40 = vld [vmem:[#allocation22 + $0x98] sm:$0xff]  ;;  %v1553_v42 = vld [vmem:[#allocation22 + $0xa0] sm:$0xff] }
 0x304   : > { %v1174_v45 = vadd.f32 %v1173_v41, %v1170_v43  ;;  %v4848_v41 = vpack.c.bf16 %v1552_v40, %v1551_v39  ;;  %v1554_v43 = vld [vmem:[#allocation22 + $0xa8] sm:$0xff] }
 0x305   : > { %v4852_v44 = vpack.c.bf16 %v1554_v43, %v1553_v42  ;;  %v1713_v39 = vld [vmem:[#allocation25 + $0x28] sm:$0xff]  ;;  %v1715_v42 = vld [vmem:[#allocation25 + $0x38] sm:$0xff] }
 0x306   : > { %3487 = vtanh.f32 %v1174_v45  ;;  %v1555_v45 = vld [vmem:[#allocation22 + $0xb0] sm:$0xff]  ;;  %v3163_v40 = vpack.c.bf16 %v1713_v39, %v1712_v38 }
 0x307   : > { %v4856_v47 = vpack.c.bf16 %v1556_v46, %v1555_v45  ;;  %v1717_v45 = vld [vmem:[#allocation25 + $0x48] sm:$0xff] }
 0x310   : > { %v3488_v51 = vpop.eup %3487 }
 0x311   : > { %2647 = vmatmul.mubr.f32.vlgmr.msra.gmra.mrb[2].mxu0 %v3488_v51  ;;  %v1559_v51 = vld [vmem:[#allocation22 + $0xd0] sm:$0xff] }
 0x312   : > { %3062 = vmatpush3.bf16.msra.mxu0 %v3061_v48  ;;  %2716 = vmatprep.mubr.msk.f32.mxu0 %vm4092_vm0, %v4093_v1  ;;  %v1557_v48 = vld [vmem:[#allocation22 + $0xc0] sm:$0xff] }
 0x313   : > { %3063 = vmatprep.subr.bf16.mxu0 %v4091_v0  ;;  %v4860_v50 = vpack.c.bf16 %v1558_v49, %v1557_v48  ;;  %v1718_v49 = vld [vmem:[#allocation25 + $0x50] sm:$0xff] }
 0x316   : > { %3065 = vmatpush3.bf16.msra.mxu0 %v3064_v52  ;;  %v1560_v52 = vld [vmem:[#allocation22 + $0xd8] sm:$0xff] }
 0x317   : > { %3066 = vmatprep.subr.bf16.mxu0 %v4091_v0  ;;  %v4864_v53 = vpack.c.bf16 %v1560_v52, %v1559_v51  ;;  %v1720_v52 = vld [vmem:[#allocation25 + $0x60] sm:$0xff] }
 0x31a   : > { %3068 = vmatpush3.bf16.msra.mxu0 %v3067_v55  ;;  %v1562_v55 = vld [vmem:[#allocation22 + $0xe8] sm:$0xff] }
 0x31b   : > { %3069 = vmatprep.subr.bf16.mxu0 %v4091_v0  ;;  %v4869_v56 = vpack.c.bf16 %v1562_v55, %v1561_v54  ;;  %v1722_v54 = vld [vmem:[#allocation25 + $0x70] sm:$0xff] }
 0x31e   : > { %3071 = vmatpush3.bf16.msra.mxu0 %v3070_v58  ;;  %v1564_v58 = vld [vmem:[#allocation22 + $0xf8] sm:$0xff] }
 0x31f   : > { %3072 = vmatprep.subr.bf16.mxu0 %v4091_v0  ;;  %v4873_v59 = vpack.c.bf16 %v1564_v58, %v1563_v57  ;;  %v1797_v58 = vld [vmem:[%s995_s27] sm:$0x1]  ;;  %s4991_s27 = scalar_lea.hbm %s5187_s18, %s2339_s13 }
 0x322   : > { %3074 = vmatpush3.bf16.msra.mxu0 %v3073_v61  ;;  %v4838_v25 = vpop.f32.mrb[2].mxu1 }
 0x323   : > { %3075 = vmatprep.subr.bf16.mxu0 %v4091_v0  ;;  %v2683_v26 = vpop.f32.mrb[3].mxu1 }
 0x324   : > { %v1545_v26 = vld [vmem:[#allocation22 + $0x68] sm:$0xff] }
 0x326   : > { %3077 = vmatpush3.bf16.msra.mxu0 %v3076_v2  ;;  %v1439_v2 = vld [vmem:[#allocation17] sm:$0x1] }
 0x327   : > { %3078 = vmatprep.subr.bf16.mxu0 %v4091_v0 }
 0x32a   : > { %3080 = vmatpush3.bf16.msra.mxu0 %v3079_v5 }
 0x32b   : > { %3081 = vmatprep.subr.bf16.mxu0 %v4091_v0 }
 0x32e   : > { %3083 = vmatpush3.bf16.msra.mxu0 %v3082_v8  ;;  %v4885_v8 = vpack.c.bf16 %v1533_v7, %v1532_v6 }
 0x32f   : > { %3108 = vmatprep.subr.bf16.mxu0 %v4091_v0 }
 0x331   : > { %2717 = vmatmul.mubr.f32.vlgmr.msra.gmra.mrb[4].mxu0 %v1264_v9  ;;  %v1534_v9 = vld [vmem:[#allocation22 + $0x10] sm:$0xff] }
 0x332   : > { %2786 = vmatprep.mubr.msk.f32.mxu0 %vm4092_vm0, %v4093_v1  ;;  %3110 = vmatpush3.bf16.msra.mxu0 %v4842_v37  ;;  %v4888_v12 = vpack.c.bf16 %v1535_v10, %v1534_v9  ;;  %v1705_v10 = vld [vmem:[#allocation23] sm:$0x1] }
 0x333   : > { %3111 = vmatprep.subr.bf16.mxu0 %v4091_v0 }
 0x336   : > { %3113 = vmatpush3.bf16.msra.mxu0 %v4848_v41 }
 0x337   : > { %3114 = vmatprep.subr.bf16.mxu0 %v4091_v0 }
 0x33a   : > { %3116 = vmatpush3.bf16.msra.mxu0 %v4852_v44 }
 0x33b   : > { %3117 = vmatprep.subr.bf16.mxu0 %v4091_v0 }
 0x33e   : > { %3119 = vmatpush3.bf16.msra.mxu0 %v4856_v47 }
 0x33f   : > { %3120 = vmatprep.subr.bf16.mxu0 %v4091_v0 }
 0x342   : > { %3122 = vmatpush3.bf16.msra.mxu0 %v4860_v50 }
 0x343   : > { %3123 = vmatprep.subr.bf16.mxu0 %v4091_v0 }
 0x346   : > { %3125 = vmatpush3.bf16.msra.mxu0 %v4864_v53 }
 0x347   : > { %3126 = vmatprep.subr.bf16.mxu0 %v4091_v0 }
 0x34a   : > { %3128 = vmatpush3.bf16.msra.mxu0 %v4869_v56 }
 0x34b   : > { %3129 = vmatprep.subr.bf16.mxu0 %v4091_v0 }
 0x34e   : > { %3131 = vmatpush3.bf16.msra.mxu0 %v4873_v59 }
 0x34f   : > { %3156 = vmatprep.subr.bf16.mxu0 %v4091_v0 }
 0x351   : > { %2787 = vmatmul.mubr.f32.vlgmr.msra.gmra.mrb[6].mxu0 %v1531_v60  ;;  %v1458_v60 = vld [vmem:[#allocation20] sm:$0x1] }
 0x352   : > { %2856 = vmatprep.mubr.msk.f32.mxu0 %vm4092_vm0, %v4093_v1  ;;  %3158 = vmatpush3.bf16.msra.mxu0 %v3157_v34 }
 0x353   : > { %3159 = vmatprep.subr.bf16.mxu0 %v4091_v0 }
 0x3e4   : > { %v4882_v61 = vpop.f32.mrb[2].mxu0 }
 0x3e5   : > { %v2648_v62 = vpop.f32.mrb[3].mxu0 }
 0x404   : > { %v1435_v63 = vpop.f32.mrb[4].mxu0 }
 0x405   : > { %v1436_v3 = vadd.f32 %v1435_v63, %v4838_v25  ;;  %v2718_v4 = vpop.f32.mrb[5].mxu0  ;;  %v1544_v25 = vld [vmem:[#allocation22 + $0x60] sm:$0xff] }
 0x406   : > { %v4911_v27 = vpack.c.bf16 %v1545_v26, %v1544_v25 }
 0x407   : > { %v1440_v5 = vadd.f32 %v1439_v2, %v1436_v3 }
 0x409   : > { %3489 = vtanh.f32 %v1440_v5 }
 0x413   : > { %v3490_v11 = vpop.eup %3489 }
 0x414   : > { %2752 = vmatmul.mubr.f32.vlgmr.msra.gmra.mrb[4].mxu1 %v3490_v11 }
 0x415   : > { %3134 = vmatpush3.bf16.msra.mxu1 %v4885_v8  ;;  %2821 = vmatprep.mubr.msk.f32.mxu1 %vm4092_vm0, %v4093_v1 }
 0x416   : > { %3135 = vmatprep.subr.bf16.mxu1 %v4091_v0 }
 0x419   : > { %3137 = vmatpush3.bf16.msra.mxu1 %v4888_v12 }
 0x41a   : > { %3138 = vmatprep.subr.bf16.mxu1 %v4091_v0 }
 0x41d   : > { %3140 = vmatpush3.bf16.msra.mxu1 %v4894_v15 }
 0x41e   : > { %3141 = vmatprep.subr.bf16.mxu1 %v4091_v0 }
 0x421   : > { %3143 = vmatpush3.bf16.msra.mxu1 %v4898_v18 }
 0x422   : > { %3144 = vmatprep.subr.bf16.mxu1 %v4091_v0 }
 0x425   : > { %3146 = vmatpush3.bf16.msra.mxu1 %v4903_v21 }
 0x426   : > { %3147 = vmatprep.subr.bf16.mxu1 %v4091_v0 }
 0x429   : > { %3149 = vmatpush3.bf16.msra.mxu1 %v4907_v24 }
 0x42a   : > { %3150 = vmatprep.subr.bf16.mxu1 %v4091_v0 }
 0x42d   : > { %3152 = vmatpush3.bf16.msra.mxu1 %v4911_v27 }
 0x42e   : > { %3153 = vmatprep.subr.bf16.mxu1 %v4091_v0 }
 0x431   : > { %3155 = vmatpush3.bf16.msra.mxu1 %v4915_v30 }
 0x432   : > { %3180 = vmatprep.subr.bf16.mxu1 %v4091_v0 }
 0x434   : > { %2822 = vmatmul.mubr.f32.vlgmr.msra.gmra.mrb[6].mxu1 %v1530_v31 }
 0x435   : > { %3182 = vmatpush3.bf16.msra.mxu1 %v4842_v37  ;;  %2891 = vmatprep.mubr.msk.f32.mxu1 %vm4092_vm0, %v4093_v1  ;;  %v3160_v37 = vpack.c.bf16 %v1711_v36, %v1710_v35 }
 0x436   : > { %3183 = vmatprep.subr.bf16.mxu1 %v4091_v0 }
 0x437   : > { %3161 = vmatpush3.bf16.msra.mxu0 %v3160_v37 }
 0x438   : > { %3162 = vmatprep.subr.bf16.mxu0 %v4091_v0 }
 0x439   : > { %3185 = vmatpush3.bf16.msra.mxu1 %v4848_v41  ;;  %v1714_v41 = vld [vmem:[#allocation25 + $0x30] sm:$0xff] }
 0x43a   : > { %3186 = vmatprep.subr.bf16.mxu1 %v4091_v0  ;;  %v3166_v43 = vpack.c.bf16 %v1715_v42, %v1714_v41 }
 0x43b   : > { %3164 = vmatpush3.bf16.msra.mxu0 %v3163_v40 }
 0x43c   : > { %3165 = vmatprep.subr.bf16.mxu0 %v4091_v0 }
 0x43d   : > { %3188 = vmatpush3.bf16.msra.mxu1 %v4852_v44  ;;  %v1716_v44 = vld [vmem:[#allocation25 + $0x40] sm:$0xff] }
 0x43e   : > { %3189 = vmatprep.subr.bf16.mxu1 %v4091_v0  ;;  %v3169_v46 = vpack.c.bf16 %v1717_v45, %v1716_v44 }
 0x43f   : > { %3167 = vmatpush3.bf16.msra.mxu0 %v3166_v43 }
 0x440   : > { %3168 = vmatprep.subr.bf16.mxu0 %v4091_v0 }
 0x441   : > { %3191 = vmatpush3.bf16.msra.mxu1 %v4856_v47  ;;  %v1631_v47 = vpop.f32.mrb[6].mxu0 }
 0x442   : > { %3192 = vmatprep.subr.bf16.mxu1 %v4091_v0  ;;  %v2788_v48 = vpop.f32.mrb[7].mxu0 }
 0x443   : > { %3170 = vmatpush3.bf16.msra.mxu0 %v3169_v46 }
 0x444   : > { %3171 = vmatprep.subr.bf16.mxu0 %v4091_v0 }
 0x445   : > { %3194 = vmatpush3.bf16.msra.mxu1 %v4860_v50  ;;  %v1719_v50 = vld [vmem:[#allocation25 + $0x58] sm:$0xff] }
 0x446   : > { %3195 = vmatprep.subr.bf16.mxu1 %v4091_v0  ;;  %v3172_v51 = vpack.c.bf16 %v1719_v50, %v1718_v49 }
 0x448   : > { %3173 = vmatpush3.bf16.msra.mxu0 %v3172_v51 }
 0x449   : > { %3197 = vmatpush3.bf16.msra.mxu1 %v4864_v53  ;;  %3174 = vmatprep.subr.bf16.mxu0 %v4091_v0  ;;  %v1721_v53 = vld [vmem:[#allocation25 + $0x68] sm:$0xff] }
 0x44a   : > { %3198 = vmatprep.subr.bf16.mxu1 %v4091_v0  ;;  %v3175_v55 = vpack.c.bf16 %v1721_v53, %v1720_v52 }
 0x44c   : > { %3176 = vmatpush3.bf16.msra.mxu0 %v3175_v55 }
 0x44d   : > { %3200 = vmatpush3.bf16.msra.mxu1 %v4869_v56  ;;  %v1723_v56 = vld [vmem:[#allocation25 + $0x78] sm:$0xff]  ;;  %3177 = vmatprep.subr.bf16.mxu0 %v4091_v0 }
 0x44e   : > { %3201 = vmatprep.subr.bf16.mxu1 %v4091_v0  ;;  %v3178_v57 = vpack.c.bf16 %v1723_v56, %v1722_v54 }
 0x450   : > { %3179 = vmatpush3.bf16.msra.mxu0 %v3178_v57 }
 0x451   : > { %3203 = vmatpush3.bf16.msra.mxu1 %v4873_v59  ;;  %3204 = vmatprep.subr.bf16.mxu0 %v4091_v0  ;;  %v1192_v59 = vld [vmem:[#allocation14] sm:$0x1] }
 0x452   : > { %3228 = vmatprep.subr.bf16.mxu1 %v4091_v0  ;;  %v1260_v63 = vadd.f32 %v4882_v61, %v1192_v59 }
 0x454   : > { %2892 = vmatmul.mubr.f32.vlgmr.msra.gmra.mrb[8].mxu1 %v1797_v58 }
 0x455   : > { %3230 = vmatpush3.bf16.msra.mxu1 %v3157_v34  ;;  %2961 = vmatprep.mubr.msk.f32.mxu1 %vm4092_vm0, %v4093_v1 }
 0x456   : > { %3231 = vmatprep.subr.bf16.mxu1 %v4091_v0 }
 0x459   : > { %3233 = vmatpush3.bf16.msra.mxu1 %v3160_v37 }
 0x45a   : > { %3234 = vmatprep.subr.bf16.mxu1 %v4091_v0 }
 0x45d   : > { %3236 = vmatpush3.bf16.msra.mxu1 %v3163_v40 }
 0x45e   : > { %3237 = vmatprep.subr.bf16.mxu1 %v4091_v0 }
 0x461   : > { %3239 = vmatpush3.bf16.msra.mxu1 %v3166_v43 }
 0x462   : > { %3240 = vmatprep.subr.bf16.mxu1 %v4091_v0 }
 0x465   : > { %3242 = vmatpush3.bf16.msra.mxu1 %v3169_v46 }
 0x466   : > { %3243 = vmatprep.subr.bf16.mxu1 %v4091_v0 }
 0x469   : > { %3245 = vmatpush3.bf16.msra.mxu1 %v3172_v51 }
 0x46a   : > { %3246 = vmatprep.subr.bf16.mxu1 %v4091_v0 }
 0x46d   : > { %3248 = vmatpush3.bf16.msra.mxu1 %v3175_v55 }
 0x46e   : > { %3249 = vmatprep.subr.bf16.mxu1 %v4091_v0 }
 0x471   : > { %3251 = vmatpush3.bf16.msra.mxu1 %v3178_v57 }
 0x4e7   : > { %v1525_v62 = vpop.f32.mrb[4].mxu1 }
 0x4e8   : > { %v1526_v2 = vadd.f32 %v1525_v62, %v1458_v60  ;;  %v2753_v3 = vpop.f32.mrb[5].mxu1 }
 0x4ea   : > { %3491 = vtanh.f32 %v1526_v2 }
 0x4eb   : > { %3493 = vtanh.f32 %v1260_v63 }
 0x4f4   : > { %v3492_v4 = vpop.eup %3491 }
 0x4f5   : > { %v2013_v5 = vrot.slane %v3492_v4, 7  ;;  %v3494_v6 = vpop.eup %3493 }
 0x4f7   : > { %v2018_v7 = vsel %vm2017_vm1, %v3494_v6, %v2013_v5 }
 0x507   : > { %v1701_v9 = vpop.f32.mrb[6].mxu1 }
 0x508   : > { %v1702_v11 = vadd.f32 %v1701_v9, %v1631_v47  ;;  %v2823_v13 = vpop.f32.mrb[7].mxu1 }
 0x50a   : > { %v1706_v14 = vadd.f32 %v1705_v10, %v1702_v11 }
 0x50c   : > { %3495 = vtanh.f32 %v1706_v14 }
 0x516   : > { %v3496_v16 = vpop.eup %3495 }
 0x517   : > { %2857 = vmatmul.mubr.f32.vlgmr.msra.gmra.mrb[8].mxu0 %v3496_v16 }
 0x518   : > { %3206 = vmatpush3.bf16.msra.mxu0 %v4885_v8  ;;  %2926 = vmatprep.mubr.msk.f32.mxu0 %vm4092_vm0, %v4093_v1  ;;  %v1796_v1 = vld [vmem:[%s988_s24] sm:$0x1] }
 0x519   : > { %3207 = vmatprep.subr.bf16.mxu0 %v4091_v0 }
 0x51c   : > { %3209 = vmatpush3.bf16.msra.mxu0 %v4888_v12 }
 0x51d   : > { %3210 = vmatprep.subr.bf16.mxu0 %v4091_v0 }
 0x520   : > { %3212 = vmatpush3.bf16.msra.mxu0 %v4894_v15 }
 0x521   : > { %3213 = vmatprep.subr.bf16.mxu0 %v4091_v0 }
 0x524   : > { %3215 = vmatpush3.bf16.msra.mxu0 %v4898_v18 }
 0x525   : > { %3216 = vmatprep.subr.bf16.mxu0 %v4091_v0 }
 0x527   : > { %v1864_v61 = vpop.f32.mrb[8].mxu1 }
 0x528   : > { %3218 = vmatpush3.bf16.msra.mxu0 %v4903_v21  ;;  %v2893_v8 = vpop.f32.mrb[9].mxu1  ;;  %v1724_v21 = vld [vmem:[#allocation26] sm:$0x1] }
 0x529   : > { %3219 = vmatprep.subr.bf16.mxu0 %v4091_v0 }
 0x52c   : > { %3221 = vmatpush3.bf16.msra.mxu0 %v4907_v24 }
 0x52d   : > { %3222 = vmatprep.subr.bf16.mxu0 %v4091_v0 }
 0x530   : > { %3224 = vmatpush3.bf16.msra.mxu0 %v4911_v27 }
 0x531   : > { %3225 = vmatprep.subr.bf16.mxu0 %v4091_v0 }
 0x534   : > { %3227 = vmatpush3.bf16.msra.mxu0 %v4915_v30 }
 0x537   : > { %2927 = vmatmul.mubr.f32.vlgmr.msra.gmra.mrb[10].mxu0 %v1796_v1 }
 0x5ea   : > { %v1791_v12 = vpop.f32.mrb[8].mxu0 }
 0x5eb   : > { %v2858_v15 = vpop.f32.mrb[9].mxu0  ;;  %v1792_v23 = vadd.f32 %v1791_v12, %v1724_v21 }
 0x60a   : > { %v1934_v17 = vpop.f32.mrb[10].mxu0 }
 0x60b   : > { %v1935_v18 = vadd.f32 %v1934_v17, %v1864_v61  ;;  %v2928_v19 = vpop.f32.mrb[11].mxu0 }
 0x60d   : > { %v1938_v20 = vadd.f32 %v1935_v18, %v1705_v10 }
 0x60f   : > { %3497 = vtanh.f32 %v1938_v20 }
 0x619   : > { %v3498_v0 = vpop.eup %3497 }
 0x61a   : > { %2962 = vmatmul.mubr.f32.vlgmr.msra.gmra.mrb[10].mxu1 %v3498_v0 }
 0x6ed   : > { %v2006_v22 = vpop.f32.mrb[10].mxu1 }
 0x6ee   : > { %v2007_v24 = vadd.f32 %v2006_v22, %v1724_v21  ;;  %v2963_v25 = vpop.f32.mrb[11].mxu1 }
 0x6f0   : > { %3499 = vtanh.f32 %v2007_v24 }
 0x6f1   : > { %3501 = vtanh.f32 %v1792_v23 }
 0x6fa   : > { %v3500_v26 = vpop.eup %3499 }
 0x6fb   : > { %v2014_v27 = vrot.slane %v3500_v26, 7  ;;  %v3502_v28 = vpop.eup %3501 }
 0x6fd   : > { %v2019_v29 = vsel %vm2017_vm1, %v3502_v28, %v2014_v27 }
 0x6fe   : > { %v2022_v30 = vcombine.low %v2018_v7, %v2019_v29 }
 0x700   : > { %2333 = vst.sshfl [vmem:[%s961_s2] sm:$0x33 pattern:$0x76325410] %v2022_v30 }
 0x701   : > { %3936 = shalt.err (!%p3933_p3)
}
 0x702   : > { %s3937_s23 = scalar_lea.hbm %s4991_s27, 64  ;;  %s3941_s9 = scalar_lea.hbm %s5187_s18, 256 }
 0x703   : > { %p3938_p2 = scmp.ne.s32.totalorder %s4991_s27, %s3937_s23  ;;  %p3942_p4 = scmp.lt.u32.totalorder %s4991_s27, %s5187_s18 }
 0x704   : > { %p3943_p1 = scmp.lt.u32.totalorder %s3941_s9, %s3937_s23  ;;  %p3945_p5 = scmp.lt.u32.totalorder %s3937_s23, %s4991_s27 }
 0x705   : > { %p3939_p8 = pnand %p3938_p2, %p5188_p7 }
 0x706   : > { %p3944_p10 = por %p3943_p1, %p3942_p4 }
 0x707   : > { %p3940_p13 = pneg %p3939_p8 }
 0x708   : > { %p3946_p9 = por %p3945_p5, %p3944_p10 }
 0x70a   : > { %p3947_p11 = pnand %p3946_p9, %p3940_p13 }
 0x70c   : > { %3950 = shalt.err (!%p3947_p11)
}
 0x70d   : > { %3308 = dma.vmem_to_hbm [thread:$0]  (%p5188_p7), %s4993_s25, 64, %s4991_s27, %s2033_s15  }
 0x70e PF: > { %s5189_s2 = sld [smem:[#allocation44_spill]]  ;;  %p3387_p12 = scmp.ge.s32.totalorder %s4071_s29, 2 }
 0x70f   : > { %p5190_p0 = scmp.ne.s32.totalorder %s5148_s26, 0 }
 0x711   : > { %p3359_p6 = pnand %p3387_p12, %p5190_p0 }
 0x714   : > { %s2059_s7 = sand.u32 1, %s5189_s2  }
 0x715   : > { %s2060_s22 = scalar_lea.sflag [#allocation7], %s2059_s7 }
 0x716   : > { %4030 = dma.done.wait (!%p3359_p6), %s2060_s22, 64  }
 0x717   : > { %4032 = vsyncadd (!%p3359_p6), %s2060_s22, 4294967232  ;;  %s5191_s1 = sld [smem:[#allocation45_spill]]  ;;  %s5192_s8 = sld [smem:[#allocation46_spill]] }
 0x718   : > { %s5193_s25 = sld [smem:[#allocation48_spill]]  ;;  %s5194_s26 = sld [smem:[#allocation49_spill]] }
 0x719   : > { %p54_p7 = scmp.ge.s32.totalorder %s4549_s30, 6   ;;  %s5195_s7 = smov %s5202_s3 }
 0x71a   : > { %s5196_s3 = smov %s5208_s11  ;;  %s5197_s27 = smov %s4063_s4 }
 0x71b   : > { %s5198_s4 = smov %s4067_s28  ;;  %s5199_s28 = smov %s4583_s6 }
 0x71c   : > { %s5200_s29 = smov %s4549_s30  ;;  %56 = sbr.rel (!%p54_p7) target bundleno = 52 (0x34), region = 227 }
 0x723   :  { %2065 = vsyncpa [#allocation6], 1 }
 0x724   :  { %2067 = vsyncpa [#allocation6 + $0x1], 1 }
 0x725   :  { %2068 = vsyncpa [#allocation9], 1 }
 0x726   :  { %2070 = vsyncpa [#allocation9 + $0x1], 1 }
 0x727   :  { %2071 = vsyncpa [#allocation12], 1 }
 0x728   :  { %2072 = vsyncpa [#allocation15], 1 }
 0x729   :  { %2073 = vsyncpa [#allocation18], 1 }
 0x72a   :  { %2074 = vsyncpa [#allocation21], 1 }
 0x72b   :  { %2075 = vsyncpa [#allocation24], 1 }
 0x72c   :  { %2076 = vsyncpa [#allocation27], 1 }
 0x72d   :  { %2077 = vsyncpa [#allocation7], 1 }
 0x72e   :  { %2079 = vsyncpa [#allocation7 + $0x1], 1 }

</bundles_post_ra>
